<compile_context>
chip_gen: v7x
topology: tpu7x:2x2x1
jax: 0.10.0
libtpu: 0.0.40
codegen_flags: <defaults>
</compile_context>

<pallas_src>
import functools

import jax
import jax.numpy as jnp
from jax.experimental import pallas as pl
from jax.experimental.pallas import tpu as pltpu

BN_EPS = 1e-5


def _classifier_kernel(x_ref, w0_ref, w1_ref, brow_ref, b2_ref, o_ref, *, H0, H1):
    # brow = [ b0 (1,H0) | b1 (1,H1) | w2 (1,H1) ], all f32. Static slices are free.
    row = brow_ref[...]
    b0 = row[:, :H0]
    b1 = row[:, H0:H0 + H1]
    w2 = row[:, H0 + H1:]

    # --- block 0: Linear (BN folded into w0/b0) + ReLU (f32 accumulation) ---
    h = jnp.dot(x_ref[...], w0_ref[...], preferred_element_type=jnp.float32)
    h = jnp.maximum(h + b0, 0.0)

    # --- block 1: Linear (BN folded) + ReLU (+ Dropout == identity in eval) ---
    h = jnp.dot(h.astype(w1_ref.dtype), w1_ref[...],
                preferred_element_type=jnp.float32)
    h = jnp.maximum(h + b1, 0.0)

    # --- head: hidden -> 1 as VPU multiply + lane reduction; lane-dense store ---
    logits = jnp.sum(h * w2, axis=-1) + b2_ref[0]                      # (TB,)
    o_ref[...] = jax.nn.sigmoid(logits)[None, :].astype(o_ref.dtype)   # (1, TB)


def _pick_batch_tile(B, max_batch_tile):
    """grid=1 for small batches; otherwise an even step count >= 2 (v7x 2 TCs),
    tiles rounded to a multiple of 128 (lane-dense output / (8,128) legality)."""
    if B <= max_batch_tile:
        return B
    steps = 2 * pl.cdiv(B, 2 * max_batch_tile)       # even, >= 2
    tile = pl.cdiv(B, steps)
    tile = ((tile + 127) // 128) * 128
    return min(tile, B)


def classifier_forward(x, params, *, max_batch_tile=2048):
    """x: (B, D_in). params: output of fold_bn_params. Returns (B, 1) float32."""
    B, D_in = x.shape
    w0, w1 = params["w0"], params["w1"]              # already in compute dtype
    brow, b2 = params["bias_row"], params["b2"]      # f32
    compute_dtype = w0.dtype
    H0, H1 = w0.shape[1], w1.shape[1]

    batch_tile = _pick_batch_tile(B, max_batch_tile)
    grid = (pl.cdiv(B, batch_tile),)

    # Per-call cast of activations only; weights were cast once at fold time.
    xc = x.astype(compute_dtype)

    itemsize = jnp.dtype(compute_dtype).itemsize
    weight_bytes = (D_in * H0 + H0 * H1) * itemsize + (H0 + 2 * H1) * 4 + 4
    # Double-buffered x tile + output tile + resident weights (+ 1 MiB margin).
    vmem_est = (2 * batch_tile * D_in * itemsize + 2 * batch_tile * 4
                + weight_bytes + (1 << 20))
    vmem_limit = None
    if vmem_est > 12 * 1024 * 1024:                  # only when beyond v5e's 16 MiB default
        vmem_limit = min(2 * vmem_est, 48 * 1024 * 1024)

    cost = pl.CostEstimate(
        flops=2 * B * (D_in * H0 + H0 * H1 + H1),
        transcendentals=B,                            # sigmoid
        bytes_accessed=B * D_in * itemsize + weight_bytes + B * 4,
    )

    const = lambda i: (0, 0)
    kernel = functools.partial(_classifier_kernel, H0=H0, H1=H1)

    out_t = pl.pallas_call(
        kernel,
        out_shape=jax.ShapeDtypeStruct((1, B), jnp.float32),
        grid_spec=pltpu.PrefetchScalarGridSpec(
            num_scalar_prefetch=0,
            grid=grid,
            in_specs=[
                pl.BlockSpec((batch_tile, D_in), lambda i: (i, 0)),   # x tile over batch
                pl.BlockSpec((D_in, H0), const),                      # w0 (BN folded, compute dtype)
                pl.BlockSpec((H0, H1), const),                        # w1 (BN folded, compute dtype)
                pl.BlockSpec((1, H0 + 2 * H1), const),                # [b0 | b1 | w2] f32 row
                pl.BlockSpec(memory_space=pltpu.MemorySpace.SMEM),    # b2 scalar
            ],
            # Lane-dense output: (1, batch_tile) blocks of a (1, B) array.
            out_specs=pl.BlockSpec((1, batch_tile), lambda i: (0, i)),
        ),
        compiler_params=pltpu.CompilerParams(
            dimension_semantics=("parallel",),
            vmem_limit_bytes=vmem_limit),
        cost_estimate=cost,
    )(xc, w0, w1, brow, b2)

    return out_t.T  # (B, 1), matching the PyTorch module's output shape


def init_raw_params(key, input_dim, hidden_dims):
    """Deterministic synthetic PyTorch-style parameters (Linear + BatchNorm1d stats)."""
    ks = jax.random.split(key, 16)
    dims = [input_dim] + list(hidden_dims)

    def linear(kw, kb, fan_in, fan_out):
        lim = 1.0 / jnp.sqrt(fan_in)
        w = jax.random.uniform(kw, (fan_in, fan_out), jnp.float32, -lim, lim)
        b = jax.random.uniform(kb, (1, fan_out), jnp.float32, -lim, lim)
        return w, b

    raw = {}
    raw["w0"], raw["b0"] = linear(ks[0], ks[1], dims[0], dims[1])
    raw["gamma0"] = 1.0 + 0.1 * jax.random.normal(ks[2], (1, dims[1]), jnp.float32)
    raw["beta0"] = 0.1 * jax.random.normal(ks[3], (1, dims[1]), jnp.float32)
    raw["mean0"] = 0.1 * jax.random.normal(ks[4], (1, dims[1]), jnp.float32)
    raw["var0"] = jnp.abs(1.0 + 0.1 * jax.random.normal(ks[5], (1, dims[1]), jnp.float32))

    raw["w1"], raw["b1"] = linear(ks[6], ks[7], dims[1], dims[2])
    raw["gamma1"] = 1.0 + 0.1 * jax.random.normal(ks[8], (1, dims[2]), jnp.float32)
    raw["beta1"] = 0.1 * jax.random.normal(ks[9], (1, dims[2]), jnp.float32)
    raw["mean1"] = 0.1 * jax.random.normal(ks[10], (1, dims[2]), jnp.float32)
    raw["var1"] = jnp.abs(1.0 + 0.1 * jax.random.normal(ks[11], (1, dims[2]), jnp.float32))

    raw["w2"], raw["b2"] = linear(ks[12], ks[13], dims[2], 1)   # (H1,1), (1,1)
    return raw


def fold_bn_params(raw, compute_dtype=jnp.bfloat16):
    """Fold eval-mode BatchNorm1d into the preceding Linear layers (host-side),
    cast MXU operands to `compute_dtype` once, and pack the small f32 row inputs
    (b0, b1, w2) into a single (1, H0+2*H1) row."""
    s0 = raw["gamma0"] / jnp.sqrt(raw["var0"] + BN_EPS)
    t0 = raw["beta0"] - raw["mean0"] * s0
    s1 = raw["gamma1"] / jnp.sqrt(raw["var1"] + BN_EPS)
    t1 = raw["beta1"] - raw["mean1"] * s1

    b0 = raw["b0"] * s0 + t0                         # (1, H0) f32
    b1 = raw["b1"] * s1 + t1                         # (1, H1) f32
    w2_row = raw["w2"].reshape(1, -1)                # (1, H1) f32 (stays f32: VPU head)

    return {
        "w0": (raw["w0"] * s0).astype(compute_dtype),        # (D_in, H0)
        "w1": (raw["w1"] * s1).astype(compute_dtype),         # (H0, H1)
        "bias_row": jnp.concatenate([b0, b1, w2_row], axis=1),  # (1, H0+2*H1) f32
        "b2": raw["b2"].reshape(-1).astype(jnp.float32),       # (1,) scalar for SMEM
    }


def reference_forward(x, r):
    """Pure-JAX f32 reference with the un-folded BatchNorm math (eval mode)."""
    h = x @ r["w0"] + r["b0"]
    h = (h - r["mean0"]) * (r["gamma0"] / jnp.sqrt(r["var0"] + BN_EPS)) + r["beta0"]
    h = jnp.maximum(h, 0.0)
    h = h @ r["w1"] + r["b1"]
    h = (h - r["mean1"]) * (r["gamma1"] / jnp.sqrt(r["var1"] + BN_EPS)) + r["beta1"]
    h = jnp.maximum(h, 0.0)
    # Dropout: identity in eval mode.
    return jax.nn.sigmoid(h @ r["w2"] + r["b2"])


if __name__ == "__main__":
    input_dim = 32
    hidden_dims = [64, 32]

    key = jax.random.PRNGKey(0)
    kx, kp, kx2 = jax.random.split(key, 3)
    raw = init_raw_params(kp, input_dim, hidden_dims)

    # --- 1) f32 path, small batch -> grid=1 (whole batch as a single tile); tight check ---
    batch = 256
    x = jax.random.normal(kx, (batch, input_dim), jnp.float32)
    params_f32 = fold_bn_params(raw, compute_dtype=jnp.float32)
    out = classifier_forward(x, params_f32)
    out = jax.block_until_ready(out)
    ref = reference_forward(x, raw)
    assert out.shape == (batch, 1), out.shape
    assert jnp.allclose(out, ref, atol=1e-4, rtol=1e-4)

    # --- 2) bf16 MXU-operand path, larger batch -> even multi-tile grid; relaxed check ---
    batch2 = 2048
    x2 = jax.random.normal(kx2, (batch2, input_dim), jnp.float32)
    params_bf16 = fold_bn_params(raw, compute_dtype=jnp.bfloat16)
    out2 = classifier_forward(x2, params_bf16, max_batch_tile=512)   # grid=(4,), even steps
    out2 = jax.block_until_ready(out2)
    ref2 = reference_forward(x2, raw)
    assert out2.shape == (batch2, 1), out2.shape
    assert jnp.allclose(out2, ref2, atol=2.5e-2)   # bf16 operand precision, f32 accumulation

    print("KERNEL_OK")
</pallas_src>

<mosaic_0001>
module attributes {stable_mosaic.version = 11 : i64} {
  func.func @_classifier_kernel(%arg0: i32, %arg1: memref<256x32xf32, #tpu.memory_space<vmem>>, %arg2: memref<32x64xf32, #tpu.memory_space<vmem>>, %arg3: memref<64x32xf32, #tpu.memory_space<vmem>>, %arg4: memref<1x128xf32, #tpu.memory_space<vmem>>, %arg5: memref<1xf32, #tpu.memory_space<smem>>, %arg6: memref<1x256xf32, #tpu.memory_space<vmem>>) attributes {dimension_semantics = [#tpu.dimension_semantics<parallel>], iteration_bounds = array<i64: 1>, scalar_prefetch = 0 : i64, scratch_operands = 0 : i64, tpu.core_type = #tpu.core_type<tc>, window_params = [{transform_indices = @transform_0, window_bounds = array<i64: 256, 32>}, {pipeline_mode = #tpu.pipeline_mode<synchronous>, transform_indices = @transform_1, window_bounds = array<i64: 32, 64>}, {pipeline_mode = #tpu.pipeline_mode<synchronous>, transform_indices = @transform_2, window_bounds = array<i64: 64, 32>}, {pipeline_mode = #tpu.pipeline_mode<synchronous>, transform_indices = @transform_3, window_bounds = array<i64: 1, 128>}, {transform_indices = @transform_4, window_bounds = array<i64: 1>}, {transform_indices = @transform_5, window_bounds = array<i64: 1, 256>}]} {
    %c0 = arith.constant 0 : index
    %c0_0 = arith.constant 0 : index
    %0 = vector.load %arg4[%c0, %c0_0] : memref<1x128xf32, #tpu.memory_space<vmem>>, vector<1x128xf32>
    %1 = vector.extract_strided_slice %0 {offsets = [0, 0], sizes = [1, 64], strides = [1, 1]} : vector<1x128xf32> to vector<1x64xf32>
    %2 = vector.extract_strided_slice %0 {offsets = [0, 64], sizes = [1, 32], strides = [1, 1]} : vector<1x128xf32> to vector<1x32xf32>
    %3 = vector.extract_strided_slice %0 {offsets = [0, 96], sizes = [1, 32], strides = [1, 1]} : vector<1x128xf32> to vector<1x32xf32>
    %c0_1 = arith.constant 0 : index
    %c0_2 = arith.constant 0 : index
    %4 = vector.load %arg1[%c0_1, %c0_2] : memref<256x32xf32, #tpu.memory_space<vmem>>, vector<256x32xf32>
    %c0_3 = arith.constant 0 : index
    %c0_4 = arith.constant 0 : index
    %5 = vector.load %arg2[%c0_3, %c0_4] : memref<32x64xf32, #tpu.memory_space<vmem>>, vector<32x64xf32>
    %cst = arith.constant dense<0.000000e+00> : vector<256x64xf32>
    %6 = tpu.matmul %4, %5, %cst {dimension_numbers = #tpu.dot_dimension_numbers<[1], [0], [0], [1], [0, 0, 1, 1], [], []>} : vector<256x32xf32>, vector<32x64xf32>, vector<256x64xf32> -> vector<256x64xf32>
    %7 = vector.broadcast %1 : vector<1x64xf32> to vector<256x64xf32>
    %8 = arith.addf %6, %7 : vector<256x64xf32>
    %cst_5 = arith.constant 0.000000e+00 : f32
    %9 = vector.broadcast %cst_5 : f32 to vector<256x64xf32>
    %10 = arith.maximumf %8, %9 : vector<256x64xf32>
    %c0_6 = arith.constant 0 : index
    %c0_7 = arith.constant 0 : index
    %11 = vector.load %arg3[%c0_6, %c0_7] : memref<64x32xf32, #tpu.memory_space<vmem>>, vector<64x32xf32>
    %cst_8 = arith.constant dense<0.000000e+00> : vector<256x32xf32>
    %12 = tpu.matmul %10, %11, %cst_8 {dimension_numbers = #tpu.dot_dimension_numbers<[1], [0], [0], [1], [0, 0, 1, 1], [], []>} : vector<256x64xf32>, vector<64x32xf32>, vector<256x32xf32> -> vector<256x32xf32>
    %13 = vector.broadcast %2 : vector<1x32xf32> to vector<256x32xf32>
    %14 = arith.addf %12, %13 : vector<256x32xf32>
    %cst_9 = arith.constant 0.000000e+00 : f32
    %15 = vector.broadcast %cst_9 : f32 to vector<256x32xf32>
    %16 = arith.maximumf %14, %15 : vector<256x32xf32>
    %17 = vector.broadcast %3 : vector<1x32xf32> to vector<256x32xf32>
    %18 = arith.mulf %16, %17 : vector<256x32xf32>
    %cst_10 = arith.constant dense<0.000000e+00> : vector<256xf32>
    %19 = vector.multi_reduction <add>, %18, %cst_10 [1] : vector<256x32xf32> to vector<256xf32>
    %c0_11 = arith.constant 0 : index
    %20 = memref.load %arg5[%c0_11] : memref<1xf32, #tpu.memory_space<smem>>
    %21 = vector.broadcast %20 : f32 to vector<256xf32>
    %22 = arith.addf %19, %21 : vector<256xf32>
    %23 = arith.negf %22 : vector<256xf32>
    %24 = math.exp %23 : vector<256xf32>
    %cst_12 = arith.constant 1.000000e+00 : f32
    %25 = vector.broadcast %cst_12 : f32 to vector<256xf32>
    %26 = arith.addf %25, %24 : vector<256xf32>
    %27 = arith.divf %25, %26 : vector<256xf32>
    %28 = vector.shape_cast %27 : vector<256xf32> to vector<1x256xf32>
    %c0_13 = arith.constant 0 : index
    %c0_14 = arith.constant 0 : index
    %29 = vector.load %arg6[%c0_13, %c0_14] : memref<1x256xf32, #tpu.memory_space<vmem>>, vector<1x256xf32>
    tpu.vector_store %arg6[%c0_13, %c0_14], %28 {strides = array<i32>} : memref<1x256xf32, #tpu.memory_space<vmem>>, vector<1x256xf32>,
    return
  }
  func.func @transform_0(%arg0: i32) -> (i32, i32) {
    %c0_i32 = arith.constant 0 : i32
    %c0_i32_0 = arith.constant 0 : i32
    return %arg0, %c0_i32 : i32, i32
  }
  func.func @transform_1(%arg0: i32) -> (i32, i32) {
    %c0_i32 = arith.constant 0 : i32
    %c0_i32_0 = arith.constant 0 : i32
    %c0_i32_1 = arith.constant 0 : i32
    return %c0_i32, %c0_i32_0 : i32, i32
  }
  func.func @transform_2(%arg0: i32) -> (i32, i32) {
    %c0_i32 = arith.constant 0 : i32
    %c0_i32_0 = arith.constant 0 : i32
    %c0_i32_1 = arith.constant 0 : i32
    return %c0_i32, %c0_i32_0 : i32, i32
  }
  func.func @transform_3(%arg0: i32) -> (i32, i32) {
    %c0_i32 = arith.constant 0 : i32
    %c0_i32_0 = arith.constant 0 : i32
    %c0_i32_1 = arith.constant 0 : i32
    return %c0_i32, %c0_i32_0 : i32, i32
  }
  func.func @transform_4(%arg0: i32) -> i32 {
    %c0_i32 = arith.constant 0 : i32
    %c0_i32_0 = arith.constant 0 : i32
    return %c0_i32 : i32
  }
  func.func @transform_5(%arg0: i32) -> (i32, i32) {
    %c0_i32 = arith.constant 0 : i32
    %c0_i32_0 = arith.constant 0 : i32
    return %c0_i32, %arg0 : i32, i32
  }
}

</mosaic_0001>

<bundles_post_ra>
// kernel: tpu_custom_call.1
= control target key start
LH: loop header
LB: loop body
LE: loop exit
PB: predicated region body
PF: predicated region fallthrough
CT: control target
= control target key end

     0   :  { %vm65_vm0 = vcmask 261120   ;;  %s5886_s0 = inlined_call_operand.vmem [shape: f32[256,32], index: 0, kind: input, shape index: {}]   ;;  %s5887_s1 = inlined_call_operand.vmem [shape: f32[32,64], index: 1, kind: input, shape index: {}]   ;;  %s5888_s2 = inlined_call_operand.vmem [shape: f32[64,32], index: 2, kind: input, shape index: {}]   ;;  %s5889_s3 = inlined_call_operand.vmem [shape: f32[1,128], index: 3, kind: input, shape index: {}]   ;;  %s5890_s4 = inlined_call_operand.<no memory space> [shape: f32[1], index: 4, kind: input, shape index: {}]   ;;  %s5891_s5 = inlined_call_operand.hbm [shape: f32[1,256], index: 5, kind: output, shape index: {}]  }
   0x1   :  { %v55_v0 = vld [vmem:[%s5887_s1] sm:$0xff]  ;;  %v56_v1 = vld [vmem:[%s5887_s1 + $0x8] sm:$0xff]  ;;  %v57_v2 = vld [vmem:[%s5887_s1 + $0x10] sm:$0xff] }
   0x2   :  { %v4379_v3 = vpack.c.bf16 %v56_v1, %v55_v0  ;;  %v58_v4 = vld [vmem:[%s5887_s1 + $0x18] sm:$0xff]  ;;  %v23_v5 = vld [vmem:[%s5886_s0] sm:$0xff]  ;;  %v24_v7 = vld [vmem:[%s5886_s0 + $0x8] sm:$0xff] }
   0x3   :  { %v4383_v6 = vpack.c.bf16 %v58_v4, %v57_v2  ;;  %4267 = vmatprep.mubr.msk.f32.mxu0 %vm65_vm0, %v23_v5  ;;  %v25_v8 = vld [vmem:[%s5886_s0 + $0x10] sm:$0xff]  ;;  %v26_v9 = vld [vmem:[%s5886_s0 + $0x18] sm:$0xff]  ;;  %v419_v10 = vld [vmem:[%s5888_s2] sm:$0xff] }
   0x4   :  { %4380 = vmatprep.subr.bf16.mxu0 %v4379_v3  ;;  %v420_v11 = vld [vmem:[%s5888_s2 + $0x8] sm:$0xff]  ;;  %v421_v12 = vld [vmem:[%s5888_s2 + $0x10] sm:$0xff]  ;;  %v27_v13 = vld [vmem:[%s5886_s0 + $0x20] sm:$0xff] }
   0x5   :  { %4382 = vmatpush3.bf16.msra.mxu0 %v4379_v3  ;;  %v4387_v14 = vpack.c.bf16 %v420_v11, %v419_v10  ;;  %v422_v15 = vld [vmem:[%s5888_s2 + $0x18] sm:$0xff]  ;;  %v423_v17 = vld [vmem:[%s5888_s2 + $0x20] sm:$0xff]  ;;  %v424_v18 = vld [vmem:[%s5888_s2 + $0x28] sm:$0xff] }
   0x6   :  { %4384 = vmatprep.subr.bf16.mxu0 %v4383_v6  ;;  %v4391_v16 = vpack.c.bf16 %v422_v15, %v421_v12 }
   0x9   :  { %4386 = vmatpush3.bf16.msra.mxu0 %v4383_v6 }
   0xc   :  { %4268 = vmatmul.mubr.msk.f32.vlgmr.msra.gmra.mrb[0].mxu0 %vm65_vm0, %v24_v7 }
   0xd   :  { %4270 = vmatprep.mubr.msk.f32.mxu0 %vm65_vm0, %v25_v8 }
   0xe   :  { %11 = vsyncpa [#allocation4], 0  ;;  %4388 = vmatprep.subr.bf16.mxu0 %v4387_v14  ;;  %v28_v19 = vld [vmem:[%s5886_s0 + $0x28] sm:$0xff]  ;;  %v29_v20 = vld [vmem:[%s5886_s0 + $0x30] sm:$0xff]  ;;  %v4395_v21 = vpack.c.bf16 %v424_v18, %v423_v17  ;;  %4403 = vmatprep.subr.bf16.mxu1 %v4387_v14  ;;  %s4570_s28 = smov 64   ;;  %s4571_s29 = smov 32  }
   0xf   :  { %4390 = vmatpush3.bf16.msra.mxu0 %v4387_v14  ;;  %v425_v22 = vld [vmem:[%s5888_s2 + $0x30] sm:$0xff]  ;;  %v426_v23 = vld [vmem:[%s5888_s2 + $0x38] sm:$0xff]  ;;  %4407 = vmatpush3.bf16.msra.mxu1 %v4387_v14  ;;  %v31_v25 = vld [vmem:[%s5886_s0 + $0x40] sm:$0xff]  ;;  %vm430_vm1 = vcmask 523264   ;;  %vm3872_vm2 = vcmask 130112   ;;  %vm3879_vm3 = vcmask 195712  }
  0x10   :  { %4271 = vmatmul.mubr.msk.f32.gmra.mrb[2].mxu0 %vm65_vm0, %v26_v9  ;;  %4392 = vmatprep.subr.bf16.mxu0 %v4391_v16  ;;  %v30_v24 = vld [vmem:[%s5886_s0 + $0x38] sm:$0xff]  ;;  %v4399_v26 = vpack.c.bf16 %v426_v23, %v425_v22  ;;  %v32_v27 = vld [vmem:[%s5886_s0 + $0x48] sm:$0xff]  ;;  %v33_v28 = vld [vmem:[%s5886_s0 + $0x50] sm:$0xff]  ;;  %vm3886_vm4 = vcmask 261312   ;;  %vm3893_vm5 = vcmask 326912   ;;  %vm3900_vm6 = vcmask 392512  }
  0x11   :  { %4273 = vmatprep.mubr.msk.f32.mxu0 %vm65_vm0, %v27_v13  ;;  %4404 = vmatprep.subr.bf16.mxu1 %v4391_v16  ;;  %v34_v29 = vld [vmem:[%s5886_s0 + $0x58] sm:$0xff]  ;;  %v35_v30 = vld [vmem:[%s5886_s0 + $0x60] sm:$0xff]  ;;  %v36_v31 = vld [vmem:[%s5886_s0 + $0x68] sm:$0xff]  ;;  %vm3907_vm7 = vcmask 458112   ;;  %vm3914_vm8 = vcmask 523712   ;;  %vm3921_vm9 = vcmask 589312  }
  0x12   :  { %v37_v32 = vld [vmem:[%s5886_s0 + $0x70] sm:$0xff]  ;;  %v38_v33 = vld [vmem:[%s5886_s0 + $0x78] sm:$0xff]  ;;  %v39_v34 = vld [vmem:[%s5886_s0 + $0x80] sm:$0xff]  ;;  %vm3928_vm10 = vcmask 654912   ;;  %vm3935_vm11 = vcmask 720512   ;;  %vm3942_vm12 = vcmask 786112  }
  0x13   :  { %4394 = vmatpush3.bf16.msra.mxu0 %v4391_v16  ;;  %4408 = vmatpush3.bf16.msra.mxu1 %v4391_v16  ;;  %v40_v35 = vld [vmem:[%s5886_s0 + $0x88] sm:$0xff]  ;;  %v41_v36 = vld [vmem:[%s5886_s0 + $0x90] sm:$0xff]  ;;  %v42_v37 = vld [vmem:[%s5886_s0 + $0x98] sm:$0xff]  ;;  %vm3949_vm13 = vcmask 851712   ;;  %vm3956_vm14 = vcmask 917312   ;;  %vm3963_vm15 = vcmask 982912  }
  0x14   :  { %4274 = vmatmul.mubr.msk.f32.gmra.mrb[4].mxu0 %vm65_vm0, %v28_v19  ;;  %4396 = vmatprep.subr.bf16.mxu0 %v4395_v21  ;;  %v43_v38 = vld [vmem:[%s5886_s0 + $0xa0] sm:$0xff]  ;;  %v44_v39 = vld [vmem:[%s5886_s0 + $0xa8] sm:$0xff]  ;;  %v45_v40 = vld [vmem:[%s5886_s0 + $0xb0] sm:$0xff] }
  0x15   :  { %4276 = vmatprep.mubr.msk.f32.mxu0 %vm65_vm0, %v29_v20  ;;  %4405 = vmatprep.subr.bf16.mxu1 %v4395_v21  ;;  %v46_v41 = vld [vmem:[%s5886_s0 + $0xb8] sm:$0xff]  ;;  %v47_v42 = vld [vmem:[%s5886_s0 + $0xc0] sm:$0xff]  ;;  %v48_v43 = vld [vmem:[%s5886_s0 + $0xc8] sm:$0xff] }
  0x16   :  { %v49_v44 = vld [vmem:[%s5886_s0 + $0xd0] sm:$0xff]  ;;  %v50_v45 = vld [vmem:[%s5886_s0 + $0xd8] sm:$0xff]  ;;  %v51_v46 = vld [vmem:[%s5886_s0 + $0xe0] sm:$0xff] }
  0x17   :  { %4398 = vmatpush3.bf16.msra.mxu0 %v4395_v21  ;;  %4409 = vmatpush3.bf16.msra.mxu1 %v4395_v21  ;;  %v52_v47 = vld [vmem:[%s5886_s0 + $0xe8] sm:$0xff]  ;;  %v53_v48 = vld [vmem:[%s5886_s0 + $0xf0] sm:$0xff]  ;;  %v54_v49 = vld [vmem:[%s5886_s0 + $0xf8] sm:$0xff] }
  0x18   :  { %4277 = vmatmul.mubr.msk.f32.gmra.mrb[6].mxu0 %vm65_vm0, %v30_v24  ;;  %4400 = vmatprep.subr.bf16.mxu0 %v4399_v26  ;;  %v4772_v50 = vld [vmem:[%s5889_s3] ss:$0 sm:$0xff] }
  0x19   :  { %4279 = vmatprep.mubr.msk.f32.mxu0 %vm65_vm0, %v31_v25  ;;  %4406 = vmatprep.subr.bf16.mxu1 %v4399_v26 }
  0x1a   :  { %427 = vrot.lane.b32.xlu0 %v4772_v50, %s4570_s28 }
  0x1b   :  { %4402 = vmatpush3.bf16.msra.mxu0 %v4399_v26  ;;  %4410 = vmatpush3.bf16.msra.mxu1 %v4399_v26 }
  0x1c   :  { %4280 = vmatmul.mubr.msk.f32.gmra.mrb[8].mxu0 %vm65_vm0, %v32_v27 }
  0x1d   :  { %4282 = vmatprep.mubr.msk.f32.mxu0 %vm65_vm0, %v33_v28 }
  0x1e   :  { %784 = vrot.lane.b32.xlu0 %v4772_v50, %s4571_s29 }
  0x20   :  { %4283 = vmatmul.mubr.msk.f32.gmra.mrb[10].mxu0 %vm65_vm0, %v34_v29 }
  0x21   :  { %4285 = vmatprep.mubr.msk.f32.mxu0 %vm65_vm0, %v35_v30 }
  0x24   :  { %4286 = vmatmul.mubr.msk.f32.gmra.mrb[12].mxu0 %vm65_vm0, %v36_v31 }
  0x25   :  { %4288 = vmatprep.mubr.msk.f32.mxu0 %vm65_vm0, %v37_v32 }
  0x28   :  { %4289 = vmatmul.mubr.msk.f32.gmra.mrb[14].mxu0 %vm65_vm0, %v38_v33 }
  0x29   :  { %4291 = vmatprep.mubr.msk.f32.mxu0 %vm65_vm0, %v39_v34 }
  0x2c   :  { %4292 = vmatmul.mubr.msk.f32.gmra.mrb[16].mxu0 %vm65_vm0, %v40_v35 }
  0x2d   :  { %4294 = vmatprep.mubr.msk.f32.mxu0 %vm65_vm0, %v41_v36 }
  0x30   :  { %4295 = vmatmul.mubr.msk.f32.gmra.mrb[18].mxu0 %vm65_vm0, %v42_v37 }
  0x31   :  { %4297 = vmatprep.mubr.msk.f32.mxu0 %vm65_vm0, %v43_v38 }
  0x34   :  { %4298 = vmatmul.mubr.msk.f32.gmra.mrb[20].mxu0 %vm65_vm0, %v44_v39 }
  0x35   :  { %4300 = vmatprep.mubr.msk.f32.mxu0 %vm65_vm0, %v45_v40 }
  0x38   :  { %4301 = vmatmul.mubr.msk.f32.gmra.mrb[22].mxu0 %vm65_vm0, %v46_v41 }
  0x39   :  { %4303 = vmatprep.mubr.msk.f32.mxu0 %vm65_vm0, %v47_v42 }
  0x3c   :  { %4304 = vmatmul.mubr.msk.f32.gmra.mrb[24].mxu0 %vm65_vm0, %v48_v43 }
  0x3d   :  { %4306 = vmatprep.mubr.msk.f32.mxu0 %vm65_vm0, %v49_v44 }
  0x40   :  { %4307 = vmatmul.mubr.msk.f32.gmra.mrb[26].mxu0 %vm65_vm0, %v50_v45 }
  0x41   :  { %4309 = vmatprep.mubr.msk.f32.mxu0 %vm65_vm0, %v51_v46 }
  0x44   :  { %4310 = vmatmul.mubr.msk.f32.gmra.mrb[28].mxu0 %vm65_vm0, %v52_v47 }
  0x45   :  { %4312 = vmatprep.mubr.msk.f32.mxu0 %vm65_vm0, %v53_v48 }
  0x48   :  { %4313 = vmatmul.mubr.msk.f32.gmra.mrb[30].mxu0 %vm65_vm0, %v54_v49 }
  0xdf   :  { %v4269_v51 = vpop.f32.mrb[0].mxu0 }
  0xe0   :  { %v234_v52 = vadd.f32 %v4269_v51, %v4772_v50  ;;  %v228_v53 = vpop.f32.mrb[1].mxu0 }
  0xe1   :  { %v229_v54 = vadd.f32 %v4772_v50, %v228_v53 }
  0xe2   :  { %v388_v57 = vmax.f32 %v234_v52, 0.0 }
  0xe3   :  { %v387_v55 = vmax.f32 %v229_v54, 0.0  ;;  %v4272_v56 = vpop.f32.mrb[2].mxu0 }
  0xe4   :  { %v244_v58 = vadd.f32 %v4272_v56, %v4772_v50  ;;  %v238_v59 = vpop.f32.mrb[3].mxu0 }
  0xe5   :  { %v239_v60 = vadd.f32 %v4772_v50, %v238_v59  ;;  %4331 = vmatprep.mubr.msk.f32.mxu0 %vm430_vm1, %v387_v55 }
  0xe6   :  { %v390_v61 = vmax.f32 %v244_v58, 0.0  ;;  %4332 = vmatmul.mubr.msk.f32.vlgmr.msra.gmra.mrb[32].mxu0 %vm430_vm1, %v388_v57 }
  0xe7   :  { %v389_v62 = vmax.f32 %v239_v60, 0.0  ;;  %v4275_v63 = vpop.f32.mrb[4].mxu0 }
  0xe8   :  { %v254_v0 = vadd.f32 %v4275_v63, %v4772_v50  ;;  %v248_v1 = vpop.f32.mrb[5].mxu0 }
  0xe9   :  { %v249_v2 = vadd.f32 %v4772_v50, %v248_v1  ;;  %4334 = vmatprep.mubr.msk.f32.mxu1 %vm430_vm1, %v389_v62 }
  0xea   :  { %v392_v3 = vmax.f32 %v254_v0, 0.0  ;;  %4335 = vmatmul.mubr.msk.f32.vlgmr.msra.gmra.mrb[0].mxu1 %vm430_vm1, %v390_v61 }
  0xeb   :  { %v391_v4 = vmax.f32 %v249_v2, 0.0  ;;  %v4278_v5 = vpop.f32.mrb[6].mxu0 }
  0xec   :  { %v264_v6 = vadd.f32 %v4278_v5, %v4772_v50  ;;  %v258_v7 = vpop.f32.mrb[7].mxu0 }
  0xed   :  { %v259_v8 = vadd.f32 %v4772_v50, %v258_v7  ;;  %4337 = vmatprep.mubr.msk.f32.mxu1 %vm430_vm1, %v391_v4 }
  0xee   :  { %v394_v9 = vmax.f32 %v264_v6, 0.0  ;;  %4338 = vmatmul.mubr.msk.f32.gmra.mrb[2].mxu1 %vm430_vm1, %v392_v3 }
  0xef   :  { %v393_v10 = vmax.f32 %v259_v8, 0.0  ;;  %v4281_v11 = vpop.f32.mrb[8].mxu0 }
  0xf0   :  { %v274_v12 = vadd.f32 %v4281_v11, %v4772_v50  ;;  %v268_v13 = vpop.f32.mrb[9].mxu0 }
  0xf1   :  { %v269_v14 = vadd.f32 %v4772_v50, %v268_v13  ;;  %4340 = vmatprep.mubr.msk.f32.mxu1 %vm430_vm1, %v393_v10 }
  0xf2   :  { %v396_v15 = vmax.f32 %v274_v12, 0.0  ;;  %4341 = vmatmul.mubr.msk.f32.gmra.mrb[4].mxu1 %vm430_vm1, %v394_v9 }
  0xf3   :  { %v395_v16 = vmax.f32 %v269_v14, 0.0  ;;  %v4284_v17 = vpop.f32.mrb[10].mxu0 }
  0xf4   :  { %v284_v18 = vadd.f32 %v4284_v17, %v4772_v50  ;;  %v278_v19 = vpop.f32.mrb[11].mxu0 }
  0xf5   :  { %v279_v20 = vadd.f32 %v4772_v50, %v278_v19  ;;  %4343 = vmatprep.mubr.msk.f32.mxu1 %vm430_vm1, %v395_v16 }
  0xf6   :  { %v398_v21 = vmax.f32 %v284_v18, 0.0  ;;  %4344 = vmatmul.mubr.msk.f32.gmra.mrb[6].mxu1 %vm430_vm1, %v396_v15 }
  0xf7   :  { %v397_v22 = vmax.f32 %v279_v20, 0.0  ;;  %v4287_v23 = vpop.f32.mrb[12].mxu0  ;;  %v4840_v20 = vpop.permute.xlu0 %427 }
  0xf8   :  { %v294_v24 = vadd.f32 %v4287_v23, %v4772_v50  ;;  %v288_v25 = vpop.f32.mrb[13].mxu0 }
  0xf9   :  { %v289_v26 = vadd.f32 %v4772_v50, %v288_v25  ;;  %4346 = vmatprep.mubr.msk.f32.mxu1 %vm430_vm1, %v397_v22 }
  0xfa   :  { %v400_v27 = vmax.f32 %v294_v24, 0.0  ;;  %4347 = vmatmul.mubr.msk.f32.gmra.mrb[8].mxu1 %vm430_vm1, %v398_v21 }
  0xfb   :  { %v399_v28 = vmax.f32 %v289_v26, 0.0  ;;  %v4290_v29 = vpop.f32.mrb[14].mxu0  ;;  %v4844_v25 = vpop.permute.xlu0 %784 }
  0xfc   :  { %v304_v30 = vadd.f32 %v4290_v29, %v4772_v50  ;;  %v298_v31 = vpop.f32.mrb[15].mxu0 }
  0xfd   :  { %v299_v32 = vadd.f32 %v4772_v50, %v298_v31  ;;  %4349 = vmatprep.mubr.msk.f32.mxu1 %vm430_vm1, %v399_v28 }
  0xfe   :  { %v402_v33 = vmax.f32 %v304_v30, 0.0  ;;  %4350 = vmatmul.mubr.msk.f32.gmra.mrb[10].mxu1 %vm430_vm1, %v400_v27 }
  0xff   :  { %v401_v34 = vmax.f32 %v299_v32, 0.0  ;;  %v4293_v35 = vpop.f32.mrb[16].mxu0 }
 0x100   :  { %v314_v36 = vadd.f32 %v4293_v35, %v4772_v50  ;;  %v308_v37 = vpop.f32.mrb[17].mxu0 }
 0x101   :  { %v309_v38 = vadd.f32 %v4772_v50, %v308_v37  ;;  %4352 = vmatprep.mubr.msk.f32.mxu1 %vm430_vm1, %v401_v34 }
 0x102   :  { %v404_v39 = vmax.f32 %v314_v36, 0.0  ;;  %4353 = vmatmul.mubr.msk.f32.gmra.mrb[12].mxu1 %vm430_vm1, %v402_v33 }
 0x103   :  { %v403_v40 = vmax.f32 %v309_v38, 0.0  ;;  %v4296_v41 = vpop.f32.mrb[18].mxu0 }
 0x104   :  { %v324_v42 = vadd.f32 %v4296_v41, %v4772_v50  ;;  %v318_v43 = vpop.f32.mrb[19].mxu0 }
 0x105   :  { %v319_v44 = vadd.f32 %v4772_v50, %v318_v43  ;;  %4355 = vmatprep.mubr.msk.f32.mxu1 %vm430_vm1, %v403_v40 }
 0x106   :  { %v406_v45 = vmax.f32 %v324_v42, 0.0  ;;  %4356 = vmatmul.mubr.msk.f32.gmra.mrb[14].mxu1 %vm430_vm1, %v404_v39 }
 0x107   :  { %v405_v46 = vmax.f32 %v319_v44, 0.0  ;;  %v4299_v47 = vpop.f32.mrb[20].mxu0 }
 0x108   :  { %v334_v48 = vadd.f32 %v4299_v47, %v4772_v50  ;;  %v328_v49 = vpop.f32.mrb[21].mxu0 }
 0x109   :  { %v329_v51 = vadd.f32 %v4772_v50, %v328_v49  ;;  %4358 = vmatprep.mubr.msk.f32.mxu1 %vm430_vm1, %v405_v46 }
 0x10a   :  { %v408_v52 = vmax.f32 %v334_v48, 0.0  ;;  %4359 = vmatmul.mubr.msk.f32.gmra.mrb[16].mxu1 %vm430_vm1, %v406_v45 }
 0x10b   :  { %v407_v53 = vmax.f32 %v329_v51, 0.0  ;;  %v4302_v54 = vpop.f32.mrb[22].mxu0 }
 0x10c   :  { %v344_v55 = vadd.f32 %v4302_v54, %v4772_v50  ;;  %v338_v56 = vpop.f32.mrb[23].mxu0 }
 0x10d   :  { %v339_v57 = vadd.f32 %v4772_v50, %v338_v56  ;;  %4361 = vmatprep.mubr.msk.f32.mxu1 %vm430_vm1, %v407_v53 }
 0x10e   :  { %v410_v58 = vmax.f32 %v344_v55, 0.0  ;;  %4362 = vmatmul.mubr.msk.f32.gmra.mrb[18].mxu1 %vm430_vm1, %v408_v52 }
 0x10f   :  { %v409_v59 = vmax.f32 %v339_v57, 0.0  ;;  %v4305_v60 = vpop.f32.mrb[24].mxu0 }
 0x110   :  { %v354_v61 = vadd.f32 %v4305_v60, %v4772_v50  ;;  %v348_v62 = vpop.f32.mrb[25].mxu0 }
 0x111   :  { %v349_v63 = vadd.f32 %v4772_v50, %v348_v62  ;;  %4364 = vmatprep.mubr.msk.f32.mxu1 %vm430_vm1, %v409_v59 }
 0x112   :  { %v412_v0 = vmax.f32 %v354_v61, 0.0  ;;  %4365 = vmatmul.mubr.msk.f32.gmra.mrb[20].mxu1 %vm430_vm1, %v410_v58 }
 0x113   :  { %v411_v1 = vmax.f32 %v349_v63, 0.0  ;;  %v4308_v2 = vpop.f32.mrb[26].mxu0 }
 0x114   :  { %v364_v3 = vadd.f32 %v4308_v2, %v4772_v50  ;;  %v358_v4 = vpop.f32.mrb[27].mxu0 }
 0x115   :  { %v359_v5 = vadd.f32 %v4772_v50, %v358_v4  ;;  %4367 = vmatprep.mubr.msk.f32.mxu1 %vm430_vm1, %v411_v1 }
 0x116   :  { %v414_v6 = vmax.f32 %v364_v3, 0.0  ;;  %4368 = vmatmul.mubr.msk.f32.gmra.mrb[22].mxu1 %vm430_vm1, %v412_v0 }
 0x117   :  { %v413_v7 = vmax.f32 %v359_v5, 0.0  ;;  %v4311_v8 = vpop.f32.mrb[28].mxu0 }
 0x118   :  { %v374_v9 = vadd.f32 %v4311_v8, %v4772_v50  ;;  %v368_v10 = vpop.f32.mrb[29].mxu0 }
 0x119   :  { %v369_v11 = vadd.f32 %v4772_v50, %v368_v10  ;;  %4370 = vmatprep.mubr.msk.f32.mxu1 %vm430_vm1, %v413_v7 }
 0x11a   :  { %v416_v12 = vmax.f32 %v374_v9, 0.0  ;;  %4371 = vmatmul.mubr.msk.f32.gmra.mrb[24].mxu1 %vm430_vm1, %v414_v6 }
 0x11b   :  { %v415_v13 = vmax.f32 %v369_v11, 0.0  ;;  %v4314_v14 = vpop.f32.mrb[30].mxu0 }
 0x11c   :  { %v384_v15 = vadd.f32 %v4314_v14, %v4772_v50  ;;  %v378_v16 = vpop.f32.mrb[31].mxu0 }
 0x11d   :  { %v379_v17 = vadd.f32 %v4772_v50, %v378_v16  ;;  %4373 = vmatprep.mubr.msk.f32.mxu1 %vm430_vm1, %v415_v13 }
 0x11e   :  { %v418_v18 = vmax.f32 %v384_v15, 0.0  ;;  %4374 = vmatmul.mubr.msk.f32.gmra.mrb[26].mxu1 %vm430_vm1, %v416_v12 }
 0x11f   :  { %v417_v19 = vmax.f32 %v379_v17, 0.0 }
 0x121   :  { %4376 = vmatprep.mubr.msk.f32.mxu1 %vm430_vm1, %v417_v19 }
 0x122   :  { %4377 = vmatmul.mubr.msk.f32.gmra.mrb[28].mxu1 %vm430_vm1, %v418_v18 }
 0x1b9   :  { %v4333_v21 = vpop.f32.mrb[32].mxu0 }
 0x1ba   :  { %v599_v22 = vadd.f32 %v4333_v21, %v4840_v20  ;;  %v593_v23 = vpop.f32.mrb[33].mxu0 }
 0x1bb   :  { %v594_v24 = vadd.f32 %v593_v23, %v4840_v20 }
 0x1bc   :  { %v753_v50 = vmax.f32 %v599_v22, 0.0 }
 0x1bd   :  { %v752_v26 = vmax.f32 %v594_v24, 0.0  ;;  %v4336_v27 = vpop.f32.mrb[0].mxu1 }
 0x1be   :  { %v609_v28 = vadd.f32 %v4336_v27, %v4840_v20  ;;  %v603_v29 = vpop.f32.mrb[1].mxu1  ;;  %v788_v30 = vmul.f32 %v4844_v25, %v753_v50 }
 0x1bf   :  { %v604_v31 = vadd.f32 %v603_v29, %v4840_v20  ;;  %v787_v34 = vmul.f32 %v4844_v25, %v752_v26 }
 0x1c0   :  { %v755_v32 = vmax.f32 %v609_v28, 0.0  ;;  %v822_v33 = vsel %vm65_vm0, %v788_v30, 0.0 }
 0x1c1   :  { %v754_v35 = vmax.f32 %v604_v31, 0.0  ;;  %v4339_v36 = vpop.f32.mrb[2].mxu1  ;;  %823 = vadd.xlane.f32.xlu1 %v822_v33  ;;  %v819_v42 = vsel %vm65_vm0, %v787_v34, 0.0 }
 0x1c2   :  { %v619_v37 = vadd.f32 %v4339_v36, %v4840_v20  ;;  %v613_v38 = vpop.f32.mrb[3].mxu1  ;;  %v790_v43 = vmul.f32 %v4844_v25, %v755_v32 }
 0x1c3   :  { %v789_v39 = vmul.f32 %v4844_v25, %v754_v35  ;;  %v614_v41 = vadd.f32 %v613_v38, %v4840_v20 }
 0x1c4   :  { %v757_v40 = vmax.f32 %v619_v37, 0.0  ;;  %v828_v49 = vsel %vm65_vm0, %v790_v43, 0.0 }
 0x1c5   :  { %v4342_v44 = vpop.f32.mrb[4].mxu1  ;;  %820 = vadd.xlane.f32.xlu1 %v819_v42  ;;  %v825_v45 = vsel %vm65_vm0, %v789_v39, 0.0  ;;  %v756_v47 = vmax.f32 %v614_v41, 0.0 }
 0x1c6   :  { %v623_v46 = vpop.f32.mrb[5].mxu1  ;;  %826 = vadd.xlane.f32.xlu0 %v825_v45  ;;  %v629_v48 = vadd.f32 %v4342_v44, %v4840_v20  ;;  %v792_v51 = vmul.f32 %v4844_v25, %v757_v40 }
 0x1c7   :  { %v624_v55 = vadd.f32 %v623_v46, %v4840_v20  ;;  %v791_v57 = vmul.f32 %v4844_v25, %v756_v47 }
 0x1c8   :  { %v759_v54 = vmax.f32 %v629_v48, 0.0  ;;  %v834_v56 = vsel %vm65_vm0, %v792_v51, 0.0 }
 0x1c9   :  { %v4345_v52 = vpop.f32.mrb[6].mxu1  ;;  %829 = vadd.xlane.f32.xlu1 %v828_v49  ;;  %v758_v60 = vmax.f32 %v624_v55, 0.0  ;;  %v831_v62 = vsel %vm65_vm0, %v791_v57, 0.0 }
 0x1ca   :  { %v633_v53 = vpop.f32.mrb[7].mxu1  ;;  %v639_v61 = vadd.f32 %v4345_v52, %v4840_v20  ;;  %v794_v63 = vmul.f32 %v4844_v25, %v759_v54 }
 0x1cb   :  { %v634_v3 = vadd.f32 %v633_v53, %v4840_v20  ;;  %v793_v5 = vmul.f32 %v4844_v25, %v758_v60 }
 0x1cc   :  { %v761_v2 = vmax.f32 %v639_v61, 0.0  ;;  %v840_v4 = vsel %vm65_vm0, %v794_v63, 0.0 }
 0x1cd   :  { %v4348_v58 = vpop.f32.mrb[8].mxu1  ;;  %835 = vadd.xlane.f32.xlu1 %v834_v56  ;;  %v760_v8 = vmax.f32 %v634_v3, 0.0  ;;  %v837_v10 = vsel %vm65_vm0, %v793_v5, 0.0 }
 0x1ce   :  { %v643_v59 = vpop.f32.mrb[9].mxu1  ;;  %v649_v9 = vadd.f32 %v4348_v58, %v4840_v20  ;;  %v796_v11 = vmul.f32 %v4844_v25, %v761_v2 }
 0x1cf   :  { %v644_v15 = vadd.f32 %v643_v59, %v4840_v20  ;;  %v795_v17 = vmul.f32 %v4844_v25, %v760_v8 }
 0x1d0   :  { %v763_v14 = vmax.f32 %v649_v9, 0.0  ;;  %v846_v16 = vsel %vm65_vm0, %v796_v11, 0.0 }
 0x1d1   :  { %v4866_v0 = vpop.f32.mrb[10].mxu1  ;;  %832 = vadd.xlane.f32.xlu1 %v831_v62  ;;  %v762_v22 = vmax.f32 %v644_v15, 0.0  ;;  %v843_v23 = vsel %vm65_vm0, %v795_v17, 0.0 }
 0x1d2   :  { %v653_v1 = vpop.f32.mrb[11].mxu1  ;;  %v798_v24 = vmul.f32 %v4844_v25, %v763_v14 }
 0x1d3   :  { %v654_v21 = vadd.f32 %v653_v1, %v4840_v20  ;;  %v797_v32 = vmul.f32 %v4844_v25, %v762_v22 }
 0x1d4   :  { %v852_v31 = vsel %vm65_vm0, %v798_v24, 0.0 }
 0x1d5   :  { %v4871_v6 = vpop.f32.mrb[12].mxu1  ;;  %841 = vadd.xlane.f32.xlu1 %v840_v4  ;;  %v764_v28 = vmax.f32 %v654_v21, 0.0  ;;  %v849_v43 = vsel %vm65_vm0, %v797_v32, 0.0  ;;  %v659_v21 = vadd.f32 %v4866_v0, %v4840_v20 }
 0x1d6   :  { %v4873_v7 = vpop.f32.mrb[13].mxu1 }
 0x1d7   :  { %v799_v40 = vmul.f32 %v4844_v25, %v764_v28 }
 0x1d9   :  { %v4357_v12 = vpop.f32.mrb[14].mxu1  ;;  %838 = vadd.xlane.f32.xlu1 %v837_v10  ;;  %v855_v52 = vsel %vm65_vm0, %v799_v40, 0.0 }
 0x1da   :  { %v673_v13 = vpop.f32.mrb[15].mxu1  ;;  %v679_v29 = vadd.f32 %v4357_v12, %v4840_v20 }
 0x1db   :  { %v674_v38 = vadd.f32 %v673_v13, %v4840_v20 }
 0x1dc   :  { %v769_v37 = vmax.f32 %v679_v29, 0.0  ;;  %v765_v29 = vmax.f32 %v659_v21, 0.0 }
 0x1dd   :  { %v4360_v18 = vpop.f32.mrb[16].mxu1  ;;  %847 = vadd.xlane.f32.xlu1 %v846_v16  ;;  %v768_v49 = vmax.f32 %v674_v38, 0.0 }
 0x1de   :  { %v683_v19 = vpop.f32.mrb[17].mxu1  ;;  %v689_v51 = vadd.f32 %v4360_v18, %v4840_v20  ;;  %v804_v53 = vmul.f32 %v4844_v25, %v769_v37 }
 0x1df   :  { %v684_v61 = vadd.f32 %v683_v19, %v4840_v20  ;;  %v803_v63 = vmul.f32 %v4844_v25, %v768_v49  ;;  %v4572_v19 = vmov 0  }
 0x1e0   :  { %v771_v60 = vmax.f32 %v689_v51, 0.0  ;;  %v870_v62 = vsel %vm65_vm0, %v804_v53, 0.0  ;;  %4416 = vset.pattern.permute.xlu0 %v4572_v19  ;;  %4417 = vset.pattern.permute.xlu1 %v4572_v19 }
 0x1e1   :  { %v4363_v50 = vpop.f32.mrb[18].mxu1  ;;  %844 = vadd.xlane.f32.xlu1 %v843_v23  ;;  %v770_v9 = vmax.f32 %v684_v61, 0.0  ;;  %v867_v11 = vsel %vm65_vm0, %v803_v63, 0.0 }
 0x1e2   :  { %v699_v26 = vadd.f32 %v4363_v50, %v4840_v20  ;;  %v693_v27 = vpop.f32.mrb[19].mxu1  ;;  %v806_v12 = vmul.f32 %v4844_v25, %v771_v60 }
 0x1e3   :  { %v694_v10 = vadd.f32 %v693_v27, %v4840_v20  ;;  %v805_v24 = vmul.f32 %v4844_v25, %v770_v9 }
 0x1e4   :  { %v773_v30 = vmax.f32 %v699_v26, 0.0  ;;  %v876_v23 = vsel %vm65_vm0, %v806_v12, 0.0 }
 0x1e5   :  { %v4366_v33 = vpop.f32.mrb[20].mxu1  ;;  %853 = vadd.xlane.f32.xlu1 %v852_v31  ;;  %v772_v22 = vmax.f32 %v694_v10, 0.0  ;;  %v873_v0 = vsel %vm65_vm0, %v805_v24, 0.0 }
 0x1e6   :  { %v709_v34 = vadd.f32 %v4366_v33, %v4840_v20  ;;  %v703_v35 = vpop.f32.mrb[21].mxu1  ;;  %v808_v36 = vmul.f32 %v4844_v25, %v773_v30  ;;  %v664_v30 = vadd.f32 %v4873_v7, %v4840_v20  ;;  %v800_v7 = vmul.f32 %v4844_v25, %v765_v29 }
 0x1e7   :  { %v704_v39 = vadd.f32 %v703_v35, %v4840_v20  ;;  %v807_v31 = vmul.f32 %v4844_v25, %v772_v22 }
 0x1e8   :  { %v775_v41 = vmax.f32 %v709_v34, 0.0  ;;  %v882_v42 = vsel %vm65_vm0, %v808_v36, 0.0  ;;  %v669_v36 = vadd.f32 %v4871_v6, %v4840_v20  ;;  %v766_v37 = vmax.f32 %v664_v30, 0.0 }
 0x1e9   :  { %v774_v44 = vmax.f32 %v704_v39, 0.0  ;;  %v4369_v45 = vpop.f32.mrb[22].mxu1  ;;  %883 = vadd.xlane.f32.xlu0 %v882_v42  ;;  %850 = vadd.xlane.f32.xlu1 %v849_v43  ;;  %v879_v38 = vsel %vm65_vm0, %v807_v31, 0.0 }
 0x1ea   :  { %v719_v46 = vadd.f32 %v4369_v45, %v4840_v20  ;;  %v713_v47 = vpop.f32.mrb[23].mxu1  ;;  %v810_v48 = vmul.f32 %v4844_v25, %v775_v41  ;;  %v767_v43 = vmax.f32 %v669_v36, 0.0  ;;  %v801_v45 = vmul.f32 %v4844_v25, %v766_v37 }
 0x1eb   :  { %v714_v55 = vadd.f32 %v713_v47, %v4840_v20  ;;  %v809_v57 = vmul.f32 %v4844_v25, %v774_v44  ;;  %v858_v44 = vsel %vm65_vm0, %v800_v7, 0.0 }
 0x1ec   :  { %v777_v54 = vmax.f32 %v719_v46, 0.0  ;;  %v888_v56 = vsel %vm65_vm0, %v810_v48, 0.0  ;;  %v802_v49 = vmul.f32 %v4844_v25, %v767_v43  ;;  %v861_v53 = vsel %vm65_vm0, %v801_v45, 0.0 }
 0x1ed   :  { %v4372_v58 = vpop.f32.mrb[24].mxu1  ;;  %889 = vadd.xlane.f32.xlu0 %v888_v56  ;;  %856 = vadd.xlane.f32.xlu1 %v855_v52  ;;  %v776_v1 = vmax.f32 %v714_v55, 0.0  ;;  %v885_v3 = vsel %vm65_vm0, %v809_v57, 0.0 }
 0x1ee   :  { %v723_v59 = vpop.f32.mrb[25].mxu1  ;;  %v729_v2 = vadd.f32 %v4372_v58, %v4840_v20  ;;  %v812_v4 = vmul.f32 %v4844_v25, %v777_v54  ;;  %v864_v55 = vsel %vm65_vm0, %v802_v49, 0.0  ;;  %v4952_v58 = vstv %s5890_s4  ;;  %s4574_s4 = smov [#allocation3]  }
 0x1ef   :  { %v724_v14 = vadd.f32 %v723_v59, %v4840_v20  ;;  %v811_v16 = vmul.f32 %v4844_v25, %v776_v1  ;;  %s4078_s30 = sshll.u32 %s4574_s4, 4  ;;  %s4079_s30 = int_to_ptr.vmem [resolvable:$true] %s4078_s30 }
 0x1f0   :  { %v779_v13 = vmax.f32 %v729_v2, 0.0  ;;  %v894_v15 = vsel %vm65_vm0, %v812_v4, 0.0  ;;  %s4546_s6 = scalar_lea.vmem %s4079_s30, 32  ;;  %p4551_p1 = scmp.lt.s32.totalorder %s4079_s30, %s4079_s30 }
 0x1f1   :  { %v4375_v5 = vpop.f32.mrb[26].mxu1  ;;  %886 = vadd.xlane.f32.xlu0 %v885_v3  ;;  %871 = vadd.xlane.f32.xlu1 %v870_v62  ;;  %v778_v50 = vmax.f32 %v724_v14, 0.0  ;;  %v891_v27 = vsel %vm65_vm0, %v811_v16, 0.0  ;;  %p4547_p0 = scmp.ne.s32.totalorder %s4079_s30, %s4546_s6  ;;  %p4552_p2 = scmp.lt.s32.totalorder %s4546_s6, %s4546_s6 }
 0x1f2   :  { %v733_v8 = vpop.f32.mrb[27].mxu1  ;;  %v739_v26 = vadd.f32 %v4375_v5, %v4840_v20  ;;  %v814_v28 = vmul.f32 %v4844_v25, %v779_v13 }
 0x1f3   :  { %v734_v33 = vadd.f32 %v733_v8, %v4840_v20  ;;  %v813_v35 = vmul.f32 %v4844_v25, %v778_v50  ;;  %p4553_p3 = por %p4552_p2, %p4551_p1 }
 0x1f4   :  { %v781_v32 = vmax.f32 %v739_v26, 0.0  ;;  %v900_v34 = vsel %vm65_vm0, %v814_v28, 0.0 }
 0x1f5   :  { %v4378_v17 = vpop.f32.mrb[28].mxu1  ;;  %895 = vadd.xlane.f32.xlu0 %v894_v15  ;;  %868 = vadd.xlane.f32.xlu1 %v867_v11  ;;  %v780_v39 = vmax.f32 %v734_v33, 0.0  ;;  %v897_v41 = vsel %vm65_vm0, %v813_v35, 0.0  ;;  %v1173_v15 = vlaneseq  ;;  %p4554_p4 = pnand %p4553_p3, %p4547_p0 }
 0x1f6   :  { %v743_v18 = vpop.f32.mrb[29].mxu1  ;;  %v816_v42 = vmul.f32 %v4844_v25, %v781_v32  ;;  %v749_v6 = vadd.f32 %v4378_v17, %v4840_v20 }
 0x1f7   :  { %v744_v40 = vadd.f32 %v743_v18, %v4840_v20  ;;  %v815_v48 = vmul.f32 %v4844_v25, %v780_v39  ;;  %v4961_v22 = vshrl.u32 %v1173_v15, 7  ;;  %vm4069_vm1 = vcmp.lt.s32.totalorder %v1173_v15, 256 }
 0x1f8   :  { %v906_v47 = vsel %vm65_vm0, %v816_v42, 0.0  ;;  %v783_v51 = vmax.f32 %v749_v6, 0.0 }
 0x1f9   :  { %892 = vadd.xlane.f32.xlu0 %v891_v27  ;;  %877 = vadd.xlane.f32.xlu1 %v876_v23  ;;  %v782_v46 = vmax.f32 %v744_v40, 0.0  ;;  %v903_v52 = vsel %vm65_vm0, %v815_v48, 0.0  ;;  %v4573_v23 = vmov 1966171168   ;;  %v4969_v33 = vsub.s32 1, %v4961_v22 }
 0x1fa   :  { %v818_v56 = vmul.f32 %v4844_v25, %v783_v51  ;;  %v2202_v24 = vunpack.c.l.s4 %v4573_v23  ;;  %v4975_v36 = vsub.s32 3, %v4961_v22  ;;  %v4978_v37 = vsub.s32 4, %v4961_v22 }
 0x1fb   :  { %v817_v54 = vmul.f32 %v4844_v25, %v782_v46  ;;  %v4984_v40 = vsub.s32 6, %v4961_v22 }
 0x1fc   :  { %v912_v57 = vsel %vm65_vm0, %v818_v56, 0.0  ;;  %v2203_v31 = vunpack.c.0.s8 %v2202_v24 }
 0x1fd   :  { %901 = vadd.xlane.f32.xlu0 %v900_v34  ;;  %874 = vadd.xlane.f32.xlu1 %v873_v0  ;;  %v909_v20 = vsel %vm65_vm0, %v817_v54, 0.0  ;;  %v4965_v0 = vsub.s32 0, %v4961_v22  ;;  %v4972_v34 = vsub.s32 2, %v4961_v22  ;;  %vm3970_vm0 = vcmask 1048512  }
 0x1fe   :  { %v4990_v45 = vsub.s32 %v2203_v31, %v4961_v22 }
 0x201   :  { %898 = vadd.xlane.f32.xlu0 %v897_v41  ;;  %880 = vadd.xlane.f32.xlu1 %v879_v38  ;;  %v4981_v38 = vsub.s32 5, %v4961_v22  ;;  %v4987_v41 = vsub.s32 7, %v4961_v22 }
 0x205   :  { %907 = vadd.xlane.f32.xlu0 %v906_v47  ;;  %859 = vadd.xlane.f32.xlu1 %v858_v44 }
 0x209   :  { %904 = vadd.xlane.f32.xlu0 %v903_v52  ;;  %862 = vadd.xlane.f32.xlu1 %v861_v53 }
 0x20d   :  { %910 = vadd.xlane.f32.xlu0 %v909_v20  ;;  %865 = vadd.xlane.f32.xlu1 %v864_v55 }
 0x211   :  { %913 = vadd.xlane.f32.xlu0 %v912_v57 }
 0x24e   :  { %v824_v59 = vpop.xlane.xlu1 %823 }
 0x24f   :  { %v918_v60 = vadd.f32 %v4952_v58, %v824_v59 }
 0x251   :  { %v4152_v61 = vmul.f32 -1.442695, %v918_v60 }
 0x252   :  { %v821_v62 = vpop.xlane.xlu1 %820 }
 0x253   :  { %4418 = vpow2.f32 %v4152_v61  ;;  %v917_v63 = vadd.f32 %v4952_v58, %v821_v62  ;;  %v827_v1 = vpop.xlane.xlu0 %826 }
 0x254   :  { %v919_v25 = vadd.f32 %v4952_v58, %v827_v1 }
 0x255   :  { %v4151_v2 = vmul.f32 -1.442695, %v917_v63 }
 0x256   :  { %v4153_v3 = vmul.f32 -1.442695, %v919_v25  ;;  %v830_v4 = vpop.xlane.xlu1 %829 }
 0x257   :  { %4420 = vpow2.f32 %v4151_v2  ;;  %v920_v5 = vadd.f32 %v4952_v58, %v830_v4 }
 0x258   :  { %4422 = vpow2.f32 %v4153_v3 }
 0x259   :  { %v4154_v8 = vmul.f32 -1.442695, %v920_v5 }
 0x25a   :  { %v836_v9 = vpop.xlane.xlu1 %835 }
 0x25b   :  { %4424 = vpow2.f32 %v4154_v8  ;;  %v922_v10 = vadd.f32 %v4952_v58, %v836_v9 }
 0x25d   :  { %v4419_v11 = vpop.eup %4418  ;;  %v4156_v12 = vmul.f32 -1.442695, %v922_v10 }
 0x25e   :  { %v1046_v13 = vadd.f32 1.0, %v4419_v11  ;;  %v833_v14 = vpop.xlane.xlu1 %832 }
 0x25f   :  { %4426 = vpow2.f32 %v4156_v12  ;;  %v921_v16 = vadd.f32 %v4952_v58, %v833_v14 }
 0x260   :  { %4428 = vrcp.f32 %v1046_v13 }
 0x261   :  { %v4421_v17 = vpop.eup %4420  ;;  %v4155_v18 = vmul.f32 -1.442695, %v921_v16 }
 0x262   :  { %v1045_v19 = vadd.f32 1.0, %v4421_v17  ;;  %v842_v21 = vpop.xlane.xlu1 %841  ;;  %v4423_v26 = vpop.eup %4422 }
 0x263   :  { %4430 = vpow2.f32 %v4155_v18  ;;  %v924_v50 = vadd.f32 %v4952_v58, %v842_v21  ;;  %v1047_v35 = vadd.f32 1.0, %v4423_v26 }
 0x264   :  { %4432 = vrcp.f32 %v1045_v19 }
 0x265   :  { %v4425_v27 = vpop.eup %4424  ;;  %v4158_v28 = vmul.f32 -1.442695, %v924_v50 }
 0x266   :  { %v1048_v29 = vadd.f32 1.0, %v4425_v27  ;;  %v839_v30 = vpop.xlane.xlu1 %838 }
 0x267   :  { %4434 = vpow2.f32 %v4158_v28  ;;  %v923_v32 = vadd.f32 %v4952_v58, %v839_v30 }
 0x268   :  { %4436 = vrcp.f32 %v1048_v29 }
 0x269   :  { %v4427_v7 = vpop.eup %4426  ;;  %v4157_v39 = vmul.f32 -1.442695, %v923_v32 }
 0x26a   :  { %v4429_v42 = vpop.eup %4428  ;;  %v1050_v43 = vadd.f32 1.0, %v4427_v7  ;;  %v848_v44 = vpop.xlane.xlu1 %847 }
 0x26b   :  { %4438 = vpow2.f32 %v4157_v39  ;;  %v926_v6 = vadd.f32 %v4952_v58, %v848_v44  ;;  %v1208_v46 = vrot.slane %v4429_v42, %v4965_v0  ;;  %v1212_v47 = vrot.slane %v4429_v42, %v4969_v33 }
 0x26c   :  { %4440 = vrcp.f32 %v1047_v35  ;;  %v1216_v48 = vrot.slane %v4429_v42, %v4972_v34  ;;  %v1220_v49 = vrot.slane %v4429_v42, %v4975_v36  ;;  %v1224_v51 = vrot.slane %v4429_v42, %v4978_v37 }
 0x26d   :  { %v4431_v52 = vpop.eup %4430  ;;  %v4160_v53 = vmul.f32 -1.442695, %v926_v6  ;;  %v1228_v54 = vrot.slane %v4429_v42, %v4981_v38  ;;  %v1232_v20 = vrot.slane %v4429_v42, %v4984_v40  ;;  %v1236_v55 = vrot.slane %v4429_v42, %v4987_v41 }
 0x26e   :  { %v4433_v56 = vpop.eup %4432  ;;  %4442 = vrcp.f32 %v1050_v43  ;;  %v1049_v57 = vadd.f32 1.0, %v4431_v52  ;;  %v845_v59 = vpop.xlane.xlu1 %844  ;;  %v2246_v60 = vcombine.low %v1208_v46, %v1212_v47  ;;  %v2247_v61 = vcombine.low %v1216_v48, %v1220_v49 }
 0x26f   :  { %4444 = vpow2.f32 %v4160_v53  ;;  %v925_v62 = vadd.f32 %v4952_v58, %v845_v59  ;;  %v2248_v63 = vcombine.low %v1224_v51, %v1228_v54  ;;  %v2249_v1 = vcombine.low %v1232_v20, %v1236_v55 }
 0x270   :  { %4446 = vrcp.f32 %v1049_v57  ;;  %v2256_v25 = vrot.slane %v2246_v60, %v4990_v45  ;;  %v2263_v2 = vrot.slane %v2247_v61, %v4990_v45  ;;  %v1176_v3 = vrot.slane %v4433_v56, %v4965_v0 }
 0x271   :  { %v4435_v4 = vpop.eup %4434  ;;  %v4159_v5 = vmul.f32 -1.442695, %v925_v62  ;;  %v2270_v8 = vrot.slane %v2248_v63, %v4990_v45  ;;  %v2277_v9 = vrot.slane %v2249_v1, %v4990_v45  ;;  %v1180_v10 = vrot.slane %v4433_v56, %v4969_v33 }
 0x272   :  { %v1052_v11 = vadd.f32 1.0, %v4435_v4  ;;  %v854_v12 = vpop.xlane.xlu1 %853  ;;  %v2278_v13 = vcombine.low %v2256_v25, %v2263_v2  ;;  %v1184_v14 = vrot.slane %v4433_v56, %v4972_v34  ;;  %v1188_v16 = vrot.slane %v4433_v56, %v4975_v36  ;;  %v5010_v17 = vpop.eup %4436 }
 0x273   :  { %4448 = vpow2.f32 %v4159_v5  ;;  %v928_v18 = vadd.f32 %v4952_v58, %v854_v12  ;;  %v2279_v19 = vcombine.low %v2270_v8, %v2277_v9  ;;  %v1192_v21 = vrot.slane %v4433_v56, %v4978_v37 }
 0x274   :  { %4450 = vrcp.f32 %v1052_v11  ;;  %v2286_v23 = vrot.slane %v2278_v13, %v4990_v45  ;;  %v1196_v24 = vrot.slane %v4433_v56, %v4981_v38  ;;  %v1200_v50 = vrot.slane %v4433_v56, %v4984_v40 }
 0x275   :  { %v4439_v26 = vpop.eup %4438  ;;  %v4162_v27 = vmul.f32 -1.442695, %v928_v18  ;;  %v2293_v28 = vrot.slane %v2279_v19, %v4990_v45  ;;  %v1204_v29 = vrot.slane %v4433_v56, %v4987_v41  ;;  %v2197_v30 = vcombine.low %v1176_v3, %v1180_v10 }
 0x276   :  { %v5019_v31 = vpop.eup %4440  ;;  %v1051_v32 = vadd.f32 1.0, %v4439_v26  ;;  %v884_v35 = vpop.xlane.xlu0 %883  ;;  %v2198_v39 = vcombine.low %v1184_v14, %v1188_v16  ;;  %v2199_v42 = vcombine.low %v1192_v21, %v1196_v24  ;;  %v1272_v43 = vrot.slane %v5010_v17, %v4965_v0 }
 0x277   :  { %v851_v7 = vpop.xlane.xlu1 %850  ;;  %4452 = vpow2.f32 %v4162_v27  ;;  %v938_v44 = vadd.f32 %v4952_v58, %v884_v35  ;;  %v2294_v46 = vcombine.low %v2286_v23, %v2293_v28  ;;  %v2200_v48 = vcombine.low %v1200_v50, %v1204_v29 }
 0x278   :  { %v927_v6 = vadd.f32 %v4952_v58, %v851_v7  ;;  %v5025_v47 = vpop.eup %4442  ;;  %4454 = vrcp.f32 %v1051_v32  ;;  %v2207_v49 = vrot.slane %v2197_v30, %v4990_v45  ;;  %v2214_v51 = vrot.slane %v2198_v39, %v4990_v45 }
 0x279   :  { %v4445_v52 = vpop.eup %4444  ;;  %v4172_v53 = vmul.f32 -1.442695, %v938_v44  ;;  %3769 = vperm.xlu0 %4416, %v2294_v46   ;;  %v2221_v20 = vrot.slane %v2199_v42, %v4990_v45  ;;  %v1276_v55 = vrot.slane %v5010_v17, %v4969_v33  ;;  %v2228_v61 = vrot.slane %v2200_v48, %v4990_v45 }
 0x27a   :  { %v4161_v54 = vmul.f32 -1.442695, %v927_v6  ;;  %v5032_v56 = vpop.eup %4446  ;;  %v1054_v57 = vadd.f32 1.0, %v4445_v52  ;;  %v890_v59 = vpop.xlane.xlu0 %889  ;;  %v2229_v62 = vcombine.low %v2207_v49, %v2214_v51  ;;  %v1280_v63 = vrot.slane %v5010_v17, %v4972_v34 }
 0x27b   :  { %v857_v60 = vpop.xlane.xlu1 %856  ;;  %4456 = vpow2.f32 %v4172_v53  ;;  %v940_v1 = vadd.f32 %v4952_v58, %v890_v59  ;;  %v1284_v2 = vrot.slane %v5010_v17, %v4975_v36  ;;  %v2230_v3 = vcombine.low %v2221_v20, %v2228_v61 }
 0x27c   :  { %v929_v25 = vadd.f32 %v4952_v58, %v857_v60  ;;  %4458 = vrcp.f32 %v1054_v57  ;;  %v2237_v4 = vrot.slane %v2229_v62, %v4990_v45  ;;  %v1288_v5 = vrot.slane %v5010_v17, %v4978_v37 }
 0x27d   :  { %v4449_v8 = vpop.eup %4448  ;;  %4460 = vpow2.f32 %v4161_v54  ;;  %v4174_v9 = vmul.f32 -1.442695, %v940_v1  ;;  %v1292_v11 = vrot.slane %v5010_v17, %v4981_v38  ;;  %v2244_v14 = vrot.slane %v2230_v3, %v4990_v45 }
 0x27e   :  { %v4163_v10 = vmul.f32 -1.442695, %v929_v25  ;;  %v5046_v12 = vpop.eup %4450  ;;  %v1053_v13 = vadd.f32 1.0, %v4449_v8  ;;  %v887_v16 = vpop.xlane.xlu0 %886  ;;  %v1296_v19 = vrot.slane %v5010_v17, %v4984_v40  ;;  %v1300_v21 = vrot.slane %v5010_v17, %v4987_v41 }
 0x27f   :  { %v872_v18 = vpop.xlane.xlu1 %871  ;;  %4462 = vpow2.f32 %v4174_v9  ;;  %v939_v23 = vadd.f32 %v4952_v58, %v887_v16  ;;  %v2344_v50 = vcombine.low %v1272_v43, %v1276_v55  ;;  %v2245_v26 = vcombine.low %v2237_v4, %v2244_v14 }
 0x280   :  { %v934_v24 = vadd.f32 %v4952_v58, %v872_v18  ;;  %4464 = vrcp.f32 %v1053_v13  ;;  %v2345_v27 = vcombine.low %v1280_v63, %v1284_v2  ;;  %v2346_v28 = vcombine.low %v1288_v5, %v1292_v11 }
 0x281   :  { %v4453_v29 = vpop.eup %4452  ;;  %4466 = vpow2.f32 %v4163_v10  ;;  %v4173_v30 = vmul.f32 -1.442695, %v939_v23  ;;  %v2347_v35 = vcombine.low %v1296_v19, %v1300_v21  ;;  %3766 = vperm.xlu1 %4417, %v2245_v26   ;;  %v2354_v17 = vrot.slane %v2344_v50, %v4990_v45 }
 0x282   :  { %v4168_v32 = vmul.f32 -1.442695, %v934_v24  ;;  %v5055_v7 = vpop.eup %4454  ;;  %v1056_v39 = vadd.f32 1.0, %v4453_v29  ;;  %v2361_v42 = vrot.slane %v2345_v27, %v4990_v45  ;;  %v2368_v44 = vrot.slane %v2346_v28, %v4990_v45  ;;  %v896_v43 = vpop.xlane.xlu0 %895 }
 0x283   :  { %v869_v6 = vpop.xlane.xlu1 %868  ;;  %4468 = vpow2.f32 %v4173_v30  ;;  %v2375_v46 = vrot.slane %v2347_v35, %v4990_v45  ;;  %v942_v48 = vadd.f32 %v4952_v58, %v896_v43  ;;  %v1240_v52 = vrot.slane %v5019_v31, %v4965_v0 }
 0x284   :  { %v933_v49 = vadd.f32 %v4952_v58, %v869_v6  ;;  %4470 = vrcp.f32 %v1056_v39  ;;  %v2376_v51 = vcombine.low %v2354_v17, %v2361_v42  ;;  %v1244_v53 = vrot.slane %v5019_v31, %v4969_v33 }
 0x285   :  { %v4457_v54 = vpop.eup %4456  ;;  %4472 = vpow2.f32 %v4168_v32  ;;  %v2377_v20 = vcombine.low %v2368_v44, %v2375_v46  ;;  %v4176_v55 = vmul.f32 -1.442695, %v942_v48  ;;  %v1248_v62 = vrot.slane %v5019_v31, %v4972_v34 }
 0x286   :  { %v4167_v57 = vmul.f32 -1.442695, %v933_v49  ;;  %v5067_v59 = vpop.eup %4458  ;;  %v1066_v60 = vadd.f32 1.0, %v4457_v54  ;;  %v2384_v61 = vrot.slane %v2376_v51, %v4990_v45  ;;  %v1252_v63 = vrot.slane %v5019_v31, %v4975_v36  ;;  %v893_v9 = vpop.xlane.xlu0 %892 }
 0x287   :  { %v4461_v1 = vpop.eup %4460  ;;  %v2391_v25 = vrot.slane %v2377_v20, %v4990_v45  ;;  %4474 = vpow2.f32 %v4176_v55  ;;  %v1256_v2 = vrot.slane %v5019_v31, %v4978_v37  ;;  %v1260_v3 = vrot.slane %v5019_v31, %v4981_v38  ;;  %v878_v10 = vpop.xlane.xlu1 %877 }
 0x288   :  { %4476 = vrcp.f32 %v1066_v60  ;;  %v1055_v4 = vadd.f32 1.0, %v4461_v1  ;;  %v1264_v5 = vrot.slane %v5019_v31, %v4984_v40  ;;  %v1268_v8 = vrot.slane %v5019_v31, %v4987_v41 }
 0x289   :  { %v4463_v11 = vpop.eup %4462  ;;  %v2392_v13 = vcombine.low %v2384_v61, %v2391_v25  ;;  %4478 = vpow2.f32 %v4167_v57  ;;  %v2295_v14 = vcombine.low %v1240_v52, %v1244_v53  ;;  %v2296_v16 = vcombine.low %v1248_v62, %v1252_v63 }
 0x28a   :  { %v5083_v18 = vpop.eup %4464  ;;  %4480 = vrcp.f32 %v1055_v4  ;;  %v1068_v19 = vadd.f32 1.0, %v4463_v11  ;;  %v2297_v21 = vcombine.low %v1256_v2, %v1260_v3  ;;  %v2298_v23 = vcombine.low %v1264_v5, %v1268_v8  ;;  %v902_v55 = vpop.xlane.xlu0 %901 }
 0x28b   :  { %v4467_v24 = vpop.eup %4466  ;;  %3775 = vperm.xlu1 %4417, %v2392_v13   ;;  %v2305_v50 = vrot.slane %v2295_v14, %v4990_v45  ;;  %v2312_v26 = vrot.slane %v2296_v16, %v4990_v45  ;;  %v941_v31 = vadd.f32 %v4952_v58, %v893_v9  ;;  %v936_v27 = vadd.f32 %v4952_v58, %v878_v10  ;;  %v875_v63 = vpop.xlane.xlu1 %874 }
 0x28c   :  { %4482 = vrcp.f32 %v1068_v19  ;;  %v1057_v28 = vadd.f32 1.0, %v4467_v24  ;;  %v2319_v29 = vrot.slane %v2297_v21, %v4990_v45  ;;  %v2326_v30 = vrot.slane %v2298_v23, %v4990_v45 }
 0x28d   :  { %v4469_v32 = vpop.eup %4468  ;;  %v2327_v35 = vcombine.low %v2305_v50, %v2312_v26  ;;  %v4175_v39 = vmul.f32 -1.442695, %v941_v31  ;;  %v4170_v17 = vmul.f32 -1.442695, %v936_v27  ;;  %v1336_v42 = vrot.slane %v5025_v47, %v4965_v0 }
 0x28e   :  { %v5093_v44 = vpop.eup %4470  ;;  %4484 = vrcp.f32 %v1057_v28  ;;  %v1067_v43 = vadd.f32 1.0, %v4469_v32  ;;  %v2328_v6 = vcombine.low %v2319_v29, %v2326_v30  ;;  %v1340_v46 = vrot.slane %v5025_v47, %v4969_v33 }
 0x28f   :  { %v4473_v48 = vpop.eup %4472  ;;  %v2335_v49 = vrot.slane %v2327_v35, %v4990_v45  ;;  %4486 = vpow2.f32 %v4175_v39  ;;  %v1344_v51 = vrot.slane %v5025_v47, %v4972_v34  ;;  %v1348_v52 = vrot.slane %v5025_v47, %v4975_v36 }
 0x290   :  { %4488 = vrcp.f32 %v1067_v43  ;;  %v1062_v53 = vadd.f32 1.0, %v4473_v48  ;;  %v2342_v54 = vrot.slane %v2328_v6, %v4990_v45  ;;  %v1352_v20 = vrot.slane %v5025_v47, %v4978_v37 }
 0x291   :  { %v4475_v57 = vpop.eup %4474  ;;  %4490 = vpow2.f32 %v4170_v17  ;;  %v1356_v60 = vrot.slane %v5025_v47, %v4981_v38  ;;  %v1360_v61 = vrot.slane %v5025_v47, %v4984_v40  ;;  %v1364_v62 = vrot.slane %v5025_v47, %v4987_v41  ;;  %v899_v17 = vpop.xlane.xlu0 %898 }
 0x292   :  { %v5111_v1 = vpop.eup %4476  ;;  %4492 = vrcp.f32 %v1062_v53  ;;  %v1070_v25 = vadd.f32 1.0, %v4475_v57  ;;  %v2343_v2 = vcombine.low %v2335_v49, %v2342_v54  ;;  %v2442_v3 = vcombine.low %v1336_v42, %v1340_v46  ;;  %v881_v42 = vpop.xlane.xlu1 %880 }
 0x293   :  { %v4479_v4 = vpop.eup %4478  ;;  %v2443_v5 = vcombine.low %v1344_v51, %v1348_v52  ;;  %v2444_v8 = vcombine.low %v1352_v20, %v1356_v60  ;;  %v2445_v9 = vcombine.low %v1360_v61, %v1364_v62  ;;  %v944_v10 = vadd.f32 %v4952_v58, %v902_v55 }
 0x294   :  { %v5114_v11 = vpop.eup %4480  ;;  %4494 = vrcp.f32 %v1070_v25  ;;  %v1061_v13 = vadd.f32 1.0, %v4479_v4  ;;  %3772 = vperm.xlu1 %4417, %v2343_v2   ;;  %v2452_v47 = vrot.slane %v2442_v3, %v4990_v45  ;;  %v935_v14 = vadd.f32 %v4952_v58, %v875_v63 }
 0x295   :  { %v2459_v16 = vrot.slane %v2443_v5, %v4990_v45  ;;  %v2466_v19 = vrot.slane %v2444_v8, %v4990_v45  ;;  %v2473_v21 = vrot.slane %v2445_v9, %v4990_v45  ;;  %v4178_v23 = vmul.f32 -1.442695, %v944_v10 }
 0x296   :  { %v5121_v24 = vpop.eup %4482  ;;  %4496 = vrcp.f32 %v1061_v13  ;;  %v4169_v50 = vmul.f32 -1.442695, %v935_v14  ;;  %v1304_v26 = vrot.slane %v5032_v56, %v4965_v0  ;;  %v1308_v31 = vrot.slane %v5032_v56, %v4969_v33 }
 0x297   :  { %v2474_v27 = vcombine.low %v2452_v47, %v2459_v16  ;;  %v2475_v28 = vcombine.low %v2466_v19, %v2473_v21  ;;  %4498 = vpow2.f32 %v4178_v23  ;;  %v1312_v29 = vrot.slane %v5032_v56, %v4972_v34  ;;  %v908_v21 = vpop.xlane.xlu0 %907 }
 0x298   :  { %v5129_v30 = vpop.eup %4484  ;;  %4500 = vpow2.f32 %v4169_v50  ;;  %v1316_v32 = vrot.slane %v5032_v56, %v4975_v36  ;;  %v1320_v35 = vrot.slane %v5032_v56, %v4978_v37  ;;  %v1324_v39 = vrot.slane %v5032_v56, %v4981_v38 }
 0x299   :  { %v4487_v43 = vpop.eup %4486  ;;  %v2482_v6 = vrot.slane %v2474_v27, %v4990_v45  ;;  %v2489_v46 = vrot.slane %v2475_v28, %v4990_v45  ;;  %v1328_v48 = vrot.slane %v5032_v56, %v4984_v40  ;;  %v1332_v49 = vrot.slane %v5032_v56, %v4987_v41 }
 0x29a   :  { %v5143_v51 = vpop.eup %4488  ;;  %v1069_v52 = vadd.f32 1.0, %v4487_v43  ;;  %v2393_v53 = vcombine.low %v1304_v26, %v1308_v31  ;;  %v2394_v54 = vcombine.low %v1312_v29, %v1316_v32  ;;  %v2395_v20 = vcombine.low %v1320_v35, %v1324_v39 }
 0x29b   :  { %v4491_v55 = vpop.eup %4490  ;;  %v2490_v57 = vcombine.low %v2482_v6, %v2489_v46  ;;  %v2396_v60 = vcombine.low %v1328_v48, %v1332_v49  ;;  %v943_v61 = vadd.f32 %v4952_v58, %v899_v17  ;;  %v937_v62 = vadd.f32 %v4952_v58, %v881_v42  ;;  %v860_v46 = vpop.xlane.xlu1 %859 }
 0x29c   :  { %v5147_v63 = vpop.eup %4492  ;;  %4502 = vrcp.f32 %v1069_v52  ;;  %v1064_v25 = vadd.f32 1.0, %v4491_v55  ;;  %v2403_v2 = vrot.slane %v2393_v53, %v4990_v45  ;;  %v2410_v56 = vrot.slane %v2394_v54, %v4990_v45 }
 0x29d   :  { %3781 = vperm.xlu1 %4417, %v2490_v57   ;;  %v2417_v3 = vrot.slane %v2395_v20, %v4990_v45  ;;  %v2424_v4 = vrot.slane %v2396_v60, %v4990_v45  ;;  %v4177_v5 = vmul.f32 -1.442695, %v943_v61  ;;  %v4171_v8 = vmul.f32 -1.442695, %v937_v62 }
 0x29e   :  { %v5153_v9 = vpop.eup %4494  ;;  %4504 = vrcp.f32 %v1064_v25  ;;  %v2425_v10 = vcombine.low %v2403_v2, %v2410_v56  ;;  %v1400_v13 = vrot.slane %v5046_v12, %v4965_v0  ;;  %v1404_v47 = vrot.slane %v5046_v12, %v4969_v33 }
 0x29f   :  { %v2426_v14 = vcombine.low %v2417_v3, %v2424_v4  ;;  %4506 = vpow2.f32 %v4177_v5  ;;  %v1408_v16 = vrot.slane %v5046_v12, %v4972_v34  ;;  %v1412_v19 = vrot.slane %v5046_v12, %v4975_v36 }
 0x2a0   :  { %v5163_v23 = vpop.eup %4496  ;;  %v2433_v50 = vrot.slane %v2425_v10, %v4990_v45  ;;  %4508 = vpow2.f32 %v4171_v8  ;;  %v1416_v26 = vrot.slane %v5046_v12, %v4978_v37  ;;  %v1420_v31 = vrot.slane %v5046_v12, %v4981_v38  ;;  %v905_v8 = vpop.xlane.xlu0 %904 }
 0x2a1   :  { %v4499_v27 = vpop.eup %4498  ;;  %v2440_v28 = vrot.slane %v2426_v14, %v4990_v45  ;;  %v1424_v29 = vrot.slane %v5046_v12, %v4984_v40  ;;  %v1428_v32 = vrot.slane %v5046_v12, %v4987_v41  ;;  %v2540_v35 = vcombine.low %v1400_v13, %v1404_v47 }
 0x2a2   :  { %v4501_v39 = vpop.eup %4500  ;;  %v1072_v17 = vadd.f32 1.0, %v4499_v27  ;;  %v2541_v42 = vcombine.low %v1408_v16, %v1412_v19  ;;  %v2542_v43 = vcombine.low %v1416_v26, %v1420_v31  ;;  %v946_v6 = vadd.f32 %v4952_v58, %v908_v21 }
 0x2a3   :  { %v1063_v48 = vadd.f32 1.0, %v4501_v39  ;;  %v2441_v49 = vcombine.low %v2433_v50, %v2440_v28  ;;  %v2543_v52 = vcombine.low %v1424_v29, %v1428_v32  ;;  %v2550_v53 = vrot.slane %v2540_v35, %v4990_v45  ;;  %v863_v35 = vpop.xlane.xlu1 %862 }
 0x2a4   :  { %4510 = vrcp.f32 %v1072_v17  ;;  %v2557_v54 = vrot.slane %v2541_v42, %v4990_v45  ;;  %v2564_v20 = vrot.slane %v2542_v43, %v4990_v45  ;;  %v4180_v55 = vmul.f32 -1.442695, %v946_v6 }
 0x2a5   :  { %4512 = vrcp.f32 %v1063_v48  ;;  %3778 = vperm.xlu1 %4417, %v2441_v49   ;;  %v2571_v12 = vrot.slane %v2543_v52, %v4990_v45  ;;  %v930_v57 = vadd.f32 %v4952_v58, %v860_v46  ;;  %v1368_v60 = vrot.slane %v5055_v7, %v4965_v0 }
 0x2a6   :  { %v5183_v61 = vpop.eup %4502  ;;  %v2572_v62 = vcombine.low %v2550_v53, %v2557_v54  ;;  %4514 = vpow2.f32 %v4180_v55  ;;  %v1372_v25 = vrot.slane %v5055_v7, %v4969_v33  ;;  %v1376_v2 = vrot.slane %v5055_v7, %v4972_v34 }
 0x2a7   :  { %v2573_v56 = vcombine.low %v2564_v20, %v2571_v12  ;;  %v4164_v3 = vmul.f32 -1.442695, %v930_v57  ;;  %v1380_v4 = vrot.slane %v5055_v7, %v4975_v36  ;;  %v1384_v5 = vrot.slane %v5055_v7, %v4978_v37 }
 0x2a8   :  { %v5193_v10 = vpop.eup %4504  ;;  %v2580_v13 = vrot.slane %v2572_v62, %v4990_v45  ;;  %v1388_v47 = vrot.slane %v5055_v7, %v4981_v38  ;;  %v1392_v14 = vrot.slane %v5055_v7, %v4984_v40  ;;  %v1396_v16 = vrot.slane %v5055_v7, %v4987_v41 }
 0x2a9   :  { %v4507_v19 = vpop.eup %4506  ;;  %v2587_v21 = vrot.slane %v2573_v56, %v4990_v45  ;;  %4516 = vpow2.f32 %v4164_v3  ;;  %v2491_v50 = vcombine.low %v1368_v60, %v1372_v25  ;;  %v2492_v26 = vcombine.low %v1376_v2, %v1380_v4  ;;  %v911_v2 = vpop.xlane.xlu0 %910 }
 0x2aa   :  { %v4509_v31 = vpop.eup %4508  ;;  %v1071_v27 = vadd.f32 1.0, %v4507_v19  ;;  %v2493_v28 = vcombine.low %v1384_v5, %v1388_v47  ;;  %v2494_v29 = vcombine.low %v1392_v14, %v1396_v16  ;;  %v945_v32 = vadd.f32 %v4952_v58, %v905_v8 }
 0x2ab   :  { %v1065_v39 = vadd.f32 1.0, %v4509_v31  ;;  %v2588_v17 = vcombine.low %v2580_v13, %v2587_v21  ;;  %v2501_v42 = vrot.slane %v2491_v50, %v4990_v45  ;;  %v2508_v43 = vrot.slane %v2492_v26, %v4990_v45  ;;  %v866_v13 = vpop.xlane.xlu1 %865 }
 0x2ac   :  { %4518 = vrcp.f32 %v1071_v27  ;;  %v2515_v7 = vrot.slane %v2493_v28, %v4990_v45  ;;  %v2522_v6 = vrot.slane %v2494_v29, %v4990_v45  ;;  %v4179_v46 = vmul.f32 -1.442695, %v945_v32 }
 0x2ad   :  { %4520 = vrcp.f32 %v1065_v39  ;;  %3787 = vperm.xlu1 %4417, %v2588_v17   ;;  %v2523_v48 = vcombine.low %v2501_v42, %v2508_v43  ;;  %v931_v49 = vadd.f32 %v4952_v58, %v863_v35  ;;  %v1464_v52 = vrot.slane %v5067_v59, %v4965_v0 }
 0x2ae   :  { %v5211_v53 = vpop.eup %4510  ;;  %v2524_v54 = vcombine.low %v2515_v7, %v2522_v6  ;;  %4522 = vpow2.f32 %v4179_v46  ;;  %v1468_v20 = vrot.slane %v5067_v59, %v4969_v33  ;;  %v1472_v55 = vrot.slane %v5067_v59, %v4972_v34 }
 0x2af   :  { %v5217_v12 = vpop.eup %4512  ;;  %v2531_v57 = vrot.slane %v2523_v48, %v4990_v45  ;;  %v4165_v60 = vmul.f32 -1.442695, %v931_v49  ;;  %v1476_v62 = vrot.slane %v5067_v59, %v4975_v36  ;;  %v1480_v25 = vrot.slane %v5067_v59, %v4978_v37 }
 0x2b0   :  { %v4515_v56 = vpop.eup %4514  ;;  %v2538_v3 = vrot.slane %v2524_v54, %v4990_v45  ;;  %v1484_v4 = vrot.slane %v5067_v59, %v4981_v38  ;;  %v1488_v5 = vrot.slane %v5067_v59, %v4984_v40  ;;  %v1492_v8 = vrot.slane %v5067_v59, %v4987_v41 }
 0x2b1   :  { %v1074_v47 = vadd.f32 1.0, %v4515_v56  ;;  %4524 = vpow2.f32 %v4165_v60  ;;  %v2638_v14 = vcombine.low %v1464_v52, %v1468_v20  ;;  %v2639_v16 = vcombine.low %v1472_v55, %v1476_v62 }
 0x2b2   :  { %v2539_v19 = vcombine.low %v2531_v57, %v2538_v3  ;;  %v2640_v21 = vcombine.low %v1480_v25, %v1484_v4  ;;  %v2641_v50 = vcombine.low %v1488_v5, %v1492_v8  ;;  %v947_v26 = vadd.f32 %v4952_v58, %v911_v2 }
 0x2b3   :  { %v4517_v31 = vpop.eup %4516  ;;  %4526 = vrcp.f32 %v1074_v47  ;;  %v2648_v27 = vrot.slane %v2638_v14, %v4990_v45  ;;  %v2655_v28 = vrot.slane %v2639_v16, %v4990_v45  ;;  %v932_v29 = vadd.f32 %v4952_v58, %v866_v13 }
 0x2b4   :  { %v1058_v32 = vadd.f32 1.0, %v4517_v31  ;;  %3784 = vperm.xlu1 %4417, %v2539_v19   ;;  %v2662_v59 = vrot.slane %v2640_v21, %v4990_v45  ;;  %v2669_v35 = vrot.slane %v2641_v50, %v4990_v45  ;;  %v4181_v39 = vmul.f32 -1.442695, %v947_v26 }
 0x2b5   :  { %v2670_v17 = vcombine.low %v2648_v27, %v2655_v28  ;;  %v4166_v42 = vmul.f32 -1.442695, %v932_v29  ;;  %v1432_v43 = vrot.slane %v5083_v18, %v4965_v0  ;;  %v1436_v7 = vrot.slane %v5083_v18, %v4969_v33  ;;  %v914_v27 = vpop.xlane.xlu0 %913 }
 0x2b6   :  { %v5241_v6 = vpop.eup %4518  ;;  %4528 = vrcp.f32 %v1058_v32  ;;  %v2671_v46 = vcombine.low %v2662_v59, %v2669_v35  ;;  %v1440_v48 = vrot.slane %v5083_v18, %v4972_v34  ;;  %v1444_v49 = vrot.slane %v5083_v18, %v4975_v36 }
 0x2b7   :  { %v5247_v52 = vpop.eup %4520  ;;  %v2678_v54 = vrot.slane %v2670_v17, %v4990_v45  ;;  %4530 = vpow2.f32 %v4181_v39  ;;  %v1448_v20 = vrot.slane %v5083_v18, %v4978_v37  ;;  %v1452_v55 = vrot.slane %v5083_v18, %v4981_v38 }
 0x2b8   :  { %v4523_v57 = vpop.eup %4522  ;;  %v2685_v60 = vrot.slane %v2671_v46, %v4990_v45  ;;  %4532 = vpow2.f32 %v4166_v42  ;;  %v1456_v62 = vrot.slane %v5083_v18, %v4984_v40  ;;  %v1460_v25 = vrot.slane %v5083_v18, %v4987_v41 }
 0x2b9   :  { %v1073_v2 = vadd.f32 1.0, %v4523_v57  ;;  %v2589_v56 = vcombine.low %v1432_v43, %v1436_v7  ;;  %v2590_v3 = vcombine.low %v1440_v48, %v1444_v49  ;;  %v2591_v4 = vcombine.low %v1448_v20, %v1452_v55 }
 0x2ba   :  { %v2686_v5 = vcombine.low %v2678_v54, %v2685_v60  ;;  %v2592_v8 = vcombine.low %v1456_v62, %v1460_v25  ;;  %v1528_v13 = vrot.slane %v5093_v44, %v4965_v0  ;;  %v1532_v47 = vrot.slane %v5093_v44, %v4969_v33 }
 0x2bb   :  { %v4525_v14 = vpop.eup %4524  ;;  %4534 = vrcp.f32 %v1073_v2  ;;  %v2599_v16 = vrot.slane %v2589_v56, %v4990_v45  ;;  %v2606_v19 = vrot.slane %v2590_v3, %v4990_v45  ;;  %v2613_v18 = vrot.slane %v2591_v4, %v4990_v45 }
 0x2bc   :  { %v1059_v21 = vadd.f32 1.0, %v4525_v14  ;;  %3793 = vperm.xlu1 %4417, %v2686_v5   ;;  %v2620_v50 = vrot.slane %v2592_v8, %v4990_v45  ;;  %v1536_v26 = vrot.slane %v5093_v44, %v4972_v34  ;;  %v1540_v31 = vrot.slane %v5093_v44, %v4975_v36 }
 0x2bd   :  { %v5271_v28 = vpop.eup %4526  ;;  %v2621_v29 = vcombine.low %v2599_v16, %v2606_v19  ;;  %v1544_v32 = vrot.slane %v5093_v44, %v4978_v37  ;;  %v1548_v59 = vrot.slane %v5093_v44, %v4981_v38  ;;  %v1552_v35 = vrot.slane %v5093_v44, %v4984_v40 }
 0x2be   :  { %4536 = vrcp.f32 %v1059_v21  ;;  %v2622_v39 = vcombine.low %v2613_v18, %v2620_v50  ;;  %v1556_v17 = vrot.slane %v5093_v44, %v4987_v41  ;;  %v2736_v42 = vcombine.low %v1528_v13, %v1532_v47 }
 0x2bf   :  { %v2629_v43 = vrot.slane %v2621_v29, %v4990_v45  ;;  %v2737_v7 = vcombine.low %v1536_v26, %v1540_v31  ;;  %v2738_v46 = vcombine.low %v1544_v32, %v1548_v59  ;;  %v948_v48 = vadd.f32 %v4952_v58, %v914_v27 }
 0x2c0   :  { %v5283_v49 = vpop.eup %4528  ;;  %v2636_v54 = vrot.slane %v2622_v39, %v4990_v45  ;;  %v2739_v20 = vcombine.low %v1552_v35, %v1556_v17  ;;  %v2746_v55 = vrot.slane %v2736_v42, %v4990_v45  ;;  %v1496_v57 = vrot.slane %v5114_v11, %v4965_v0 }
 0x2c1   :  { %v4531_v60 = vpop.eup %4530  ;;  %v2753_v44 = vrot.slane %v2737_v7, %v4990_v45  ;;  %v2760_v62 = vrot.slane %v2738_v46, %v4990_v45  ;;  %v4182_v25 = vmul.f32 -1.442695, %v948_v48  ;;  %v1500_v2 = vrot.slane %v5114_v11, %v4969_v33 }
 0x2c2   :  { %v4533_v58 = vpop.eup %4532  ;;  %v1075_v56 = vadd.f32 1.0, %v4531_v60  ;;  %v2637_v3 = vcombine.low %v2629_v43, %v2636_v54  ;;  %v2767_v4 = vrot.slane %v2739_v20, %v4990_v45  ;;  %v1504_v5 = vrot.slane %v5114_v11, %v4972_v34 }
 0x2c3   :  { %v1060_v8 = vadd.f32 1.0, %v4533_v58  ;;  %v2768_v13 = vcombine.low %v2746_v55, %v2753_v44  ;;  %4538 = vpow2.f32 %v4182_v25  ;;  %v1508_v47 = vrot.slane %v5114_v11, %v4975_v36 }
 0x2c4   :  { %4540 = vrcp.f32 %v1075_v56  ;;  %3790 = vperm.xlu1 %4417, %v2637_v3   ;;  %v2769_v14 = vcombine.low %v2760_v62, %v2767_v4  ;;  %v1512_v16 = vrot.slane %v5114_v11, %v4978_v37  ;;  %v1516_v19 = vrot.slane %v5114_v11, %v4981_v38 }
 0x2c5   :  { %v5302_v18 = vpop.eup %4534  ;;  %4542 = vrcp.f32 %v1060_v8  ;;  %v2776_v21 = vrot.slane %v2768_v13, %v4990_v45  ;;  %v1520_v50 = vrot.slane %v5114_v11, %v4984_v40  ;;  %v1524_v26 = vrot.slane %v5114_v11, %v4987_v41 }
 0x2c6   :  { %v2783_v31 = vrot.slane %v2769_v14, %v4990_v45  ;;  %v2687_v27 = vcombine.low %v1496_v57, %v1500_v2  ;;  %v2688_v29 = vcombine.low %v1504_v5, %v1508_v47  ;;  %v2689_v32 = vcombine.low %v1512_v16, %v1516_v19 }
 0x2c7   :  { %v2690_v59 = vcombine.low %v1520_v50, %v1524_v26  ;;  %v1720_v35 = vrot.slane %v5147_v63, %v4965_v0  ;;  %v1724_v39 = vrot.slane %v5147_v63, %v4969_v33  ;;  %v1728_v17 = vrot.slane %v5147_v63, %v4972_v34 }
 0x2c8   :  { %v5316_v42 = vpop.eup %4536  ;;  %v2784_v43 = vcombine.low %v2776_v21, %v2783_v31  ;;  %v2697_v11 = vrot.slane %v2687_v27, %v4990_v45  ;;  %v2704_v7 = vrot.slane %v2688_v29, %v4990_v45  ;;  %v2711_v46 = vrot.slane %v2689_v32, %v4990_v45 }
 0x2c9   :  { %v2718_v48 = vrot.slane %v2690_v59, %v4990_v45  ;;  %v1732_v54 = vrot.slane %v5147_v63, %v4975_v36  ;;  %v1736_v20 = vrot.slane %v5147_v63, %v4978_v37  ;;  %v1740_v55 = vrot.slane %v5147_v63, %v4981_v38 }
 0x2ca   :  { %3799 = vperm.xlu0 %4416, %v2784_v43   ;;  %v2719_v57 = vcombine.low %v2697_v11, %v2704_v7  ;;  %v1744_v60 = vrot.slane %v5147_v63, %v4984_v40  ;;  %v1748_v44 = vrot.slane %v5147_v63, %v4987_v41  ;;  %v3030_v62 = vcombine.low %v1720_v35, %v1724_v39 }
 0x2cb   :  { %v2720_v25 = vcombine.low %v2711_v46, %v2718_v48  ;;  %v3031_v2 = vcombine.low %v1728_v17, %v1732_v54  ;;  %v3032_v58 = vcombine.low %v1736_v20, %v1740_v55  ;;  %v1784_v56 = vrot.slane %v5193_v10, %v4965_v0 }
 0x2cc   :  { %v2727_v3 = vrot.slane %v2719_v57, %v4990_v45  ;;  %v3033_v4 = vcombine.low %v1744_v60, %v1748_v44  ;;  %v3040_v5 = vrot.slane %v3030_v62, %v4990_v45  ;;  %v1788_v8 = vrot.slane %v5193_v10, %v4969_v33 }
 0x2cd   :  { %v4539_v13 = vpop.eup %4538  ;;  %v2734_v47 = vrot.slane %v2720_v25, %v4990_v45  ;;  %v3047_v63 = vrot.slane %v3031_v2, %v4990_v45  ;;  %v3054_v14 = vrot.slane %v3032_v58, %v4990_v45  ;;  %v1792_v16 = vrot.slane %v5193_v10, %v4972_v34 }
 0x2ce   :  { %v5343_v19 = vpop.eup %4540  ;;  %v1076_v21 = vadd.f32 1.0, %v4539_v13  ;;  %v3061_v50 = vrot.slane %v3033_v4, %v4990_v45  ;;  %v1796_v26 = vrot.slane %v5193_v10, %v4975_v36  ;;  %v1800_v31 = vrot.slane %v5193_v10, %v4978_v37 }
 0x2cf   :  { %v5350_v27 = vpop.eup %4542  ;;  %v2735_v29 = vcombine.low %v2727_v3, %v2734_v47  ;;  %v3062_v32 = vcombine.low %v3040_v5, %v3047_v63  ;;  %v1804_v59 = vrot.slane %v5193_v10, %v4981_v38  ;;  %v1808_v35 = vrot.slane %v5193_v10, %v4984_v40 }
 0x2d0   :  { %4544 = vrcp.f32 %v1076_v21  ;;  %v3063_v39 = vcombine.low %v3054_v14, %v3061_v50  ;;  %v1812_v17 = vrot.slane %v5193_v10, %v4987_v41  ;;  %v3128_v43 = vcombine.low %v1784_v56, %v1788_v8 }
 0x2d1   :  { %3796 = vperm.xlu0 %4416, %v2735_v29   ;;  %v3070_v11 = vrot.slane %v3062_v32, %v4990_v45  ;;  %v3129_v7 = vcombine.low %v1792_v16, %v1796_v26  ;;  %v3130_v46 = vcombine.low %v1800_v31, %v1804_v59  ;;  %v1848_v48 = vrot.slane %v5111_v1, %v4965_v0 }
 0x2d2   :  { %v3077_v54 = vrot.slane %v3063_v39, %v4990_v45  ;;  %v3131_v20 = vcombine.low %v1808_v35, %v1812_v17  ;;  %v3138_v55 = vrot.slane %v3128_v43, %v4990_v45  ;;  %v1852_v57 = vrot.slane %v5111_v1, %v4969_v33 }
 0x2d3   :  { %v3145_v60 = vrot.slane %v3129_v7, %v4990_v45  ;;  %v3152_v10 = vrot.slane %v3130_v46, %v4990_v45  ;;  %v1856_v44 = vrot.slane %v5111_v1, %v4972_v34  ;;  %v1860_v62 = vrot.slane %v5111_v1, %v4975_v36 }
 0x2d4   :  { %v3078_v25 = vcombine.low %v3070_v11, %v3077_v54  ;;  %v3159_v2 = vrot.slane %v3131_v20, %v4990_v45  ;;  %v1864_v58 = vrot.slane %v5111_v1, %v4978_v37  ;;  %v1868_v56 = vrot.slane %v5111_v1, %v4981_v38 }
 0x2d5   :  { %v3160_v3 = vcombine.low %v3138_v55, %v3145_v60  ;;  %v1872_v4 = vrot.slane %v5111_v1, %v4984_v40  ;;  %v1876_v5 = vrot.slane %v5111_v1, %v4987_v41  ;;  %v3226_v8 = vcombine.low %v1848_v48, %v1852_v57 }
 0x2d6   :  { %3817 = vperm.xlu1 %4417, %v3078_v25   ;;  %v3161_v13 = vcombine.low %v3152_v10, %v3159_v2  ;;  %v3227_v47 = vcombine.low %v1856_v44, %v1860_v62  ;;  %v3228_v63 = vcombine.low %v1864_v58, %v1868_v56  ;;  %v1912_v14 = vrot.slane %v5121_v24, %v4965_v0 }
 0x2d7   :  { %v3168_v16 = vrot.slane %v3160_v3, %v4990_v45  ;;  %v3229_v21 = vcombine.low %v1872_v4, %v1876_v5  ;;  %v3236_v50 = vrot.slane %v3226_v8, %v4990_v45  ;;  %v1916_v26 = vrot.slane %v5121_v24, %v4969_v33 }
 0x2d8   :  { %v3175_v31 = vrot.slane %v3161_v13, %v4990_v45  ;;  %v3243_v1 = vrot.slane %v3227_v47, %v4990_v45  ;;  %v3250_v29 = vrot.slane %v3228_v63, %v4990_v45  ;;  %v1920_v32 = vrot.slane %v5121_v24, %v4972_v34 }
 0x2d9   :  { %v3257_v59 = vrot.slane %v3229_v21, %v4990_v45  ;;  %v1924_v35 = vrot.slane %v5121_v24, %v4975_v36  ;;  %v1928_v39 = vrot.slane %v5121_v24, %v4978_v37  ;;  %v1932_v17 = vrot.slane %v5121_v24, %v4981_v38 }
 0x2da   :  { %v5398_v43 = vpop.eup %4544  ;;  %v3176_v11 = vcombine.low %v3168_v16, %v3175_v31  ;;  %v3258_v7 = vcombine.low %v3236_v50, %v3243_v1  ;;  %v1936_v46 = vrot.slane %v5121_v24, %v4984_v40  ;;  %v1940_v48 = vrot.slane %v5121_v24, %v4987_v41 }
 0x2db   :  { %v3259_v54 = vcombine.low %v3250_v29, %v3257_v59  ;;  %v3324_v20 = vcombine.low %v1912_v14, %v1916_v26  ;;  %v3325_v55 = vcombine.low %v1920_v32, %v1924_v35  ;;  %v3326_v57 = vcombine.low %v1928_v39, %v1932_v17 }
 0x2dc   :  { %3823 = vperm.xlu1 %4417, %v3176_v11   ;;  %v3266_v60 = vrot.slane %v3258_v7, %v4990_v45  ;;  %v3327_v10 = vcombine.low %v1936_v46, %v1940_v48  ;;  %v1976_v44 = vrot.slane %v5153_v9, %v4965_v0  ;;  %v1980_v62 = vrot.slane %v5153_v9, %v4969_v33 }
 0x2dd   :  { %v3273_v25 = vrot.slane %v3259_v54, %v4990_v45  ;;  %v3334_v2 = vrot.slane %v3324_v20, %v4990_v45  ;;  %v3341_v24 = vrot.slane %v3325_v55, %v4990_v45  ;;  %v3348_v58 = vrot.slane %v3326_v57, %v4990_v45 }
 0x2de   :  { %v3355_v56 = vrot.slane %v3327_v10, %v4990_v45  ;;  %v1984_v3 = vrot.slane %v5153_v9, %v4972_v34  ;;  %v1988_v4 = vrot.slane %v5153_v9, %v4975_v36  ;;  %v1992_v5 = vrot.slane %v5153_v9, %v4978_v37 }
 0x2df   :  { %v3274_v8 = vcombine.low %v3266_v60, %v3273_v25  ;;  %v3356_v13 = vcombine.low %v3334_v2, %v3341_v24  ;;  %v1996_v47 = vrot.slane %v5153_v9, %v4981_v38  ;;  %v2000_v63 = vrot.slane %v5153_v9, %v4984_v40 }
 0x2e0   :  { %v3357_v14 = vcombine.low %v3348_v58, %v3355_v56  ;;  %v2004_v16 = vrot.slane %v5153_v9, %v4987_v41  ;;  %v3422_v21 = vcombine.low %v1976_v44, %v1980_v62  ;;  %v3423_v50 = vcombine.low %v1984_v3, %v1988_v4 }
 0x2e1   :  { %3829 = vperm.xlu1 %4417, %v3274_v8   ;;  %v3364_v26 = vrot.slane %v3356_v13, %v4990_v45  ;;  %v3424_v31 = vcombine.low %v1992_v5, %v1996_v47  ;;  %v1592_v1 = vrot.slane %v5283_v49, %v4965_v0  ;;  %v1596_v29 = vrot.slane %v5283_v49, %v4969_v33 }
 0x2e2   :  { %v3371_v32 = vrot.slane %v3357_v14, %v4990_v45  ;;  %v3425_v59 = vcombine.low %v2000_v63, %v2004_v16  ;;  %v3432_v35 = vrot.slane %v3422_v21, %v4990_v45  ;;  %v3439_v39 = vrot.slane %v3423_v50, %v4990_v45 }
 0x2e3   :  { %v3446_v9 = vrot.slane %v3424_v31, %v4990_v45  ;;  %v1600_v17 = vrot.slane %v5283_v49, %v4972_v34  ;;  %v1604_v11 = vrot.slane %v5283_v49, %v4975_v36  ;;  %v1608_v7 = vrot.slane %v5283_v49, %v4978_v37 }
 0x2e4   :  { %v3372_v46 = vcombine.low %v3364_v26, %v3371_v32  ;;  %v3453_v48 = vrot.slane %v3425_v59, %v4990_v45  ;;  %v3454_v54 = vcombine.low %v3432_v35, %v3439_v39  ;;  %v1612_v20 = vrot.slane %v5283_v49, %v4981_v38 }
 0x2e5   :  { %v1616_v55 = vrot.slane %v5283_v49, %v4984_v40  ;;  %v1620_v57 = vrot.slane %v5283_v49, %v4987_v41  ;;  %v2834_v60 = vcombine.low %v1592_v1, %v1596_v29  ;;  %v2835_v10 = vcombine.low %v1600_v17, %v1604_v11 }
 0x2e6   :  { %3835 = vperm.xlu1 %4417, %v3372_v46   ;;  %v3455_v44 = vcombine.low %v3446_v9, %v3453_v48  ;;  %v3462_v62 = vrot.slane %v3454_v54, %v4990_v45  ;;  %v2836_v25 = vcombine.low %v1608_v7, %v1612_v20  ;;  %v2040_v2 = vrot.slane %v5211_v53, %v4965_v0 }
 0x2e7   :  { %v2837_v24 = vcombine.low %v1616_v55, %v1620_v57  ;;  %v2844_v58 = vrot.slane %v2834_v60, %v4990_v45  ;;  %v2851_v56 = vrot.slane %v2835_v10, %v4990_v45  ;;  %v2044_v3 = vrot.slane %v5211_v53, %v4969_v33 }
 0x2e8   :  { %v3469_v49 = vrot.slane %v3455_v44, %v4990_v45  ;;  %v2858_v4 = vrot.slane %v2836_v25, %v4990_v45  ;;  %v2048_v5 = vrot.slane %v5211_v53, %v4972_v34  ;;  %v2052_v8 = vrot.slane %v5211_v53, %v4975_v36 }
 0x2e9   :  { %v2865_v13 = vrot.slane %v2837_v24, %v4990_v45  ;;  %v2866_v47 = vcombine.low %v2844_v58, %v2851_v56  ;;  %v2056_v63 = vrot.slane %v5211_v53, %v4978_v37  ;;  %v2060_v14 = vrot.slane %v5211_v53, %v4981_v38 }
 0x2ea   :  { %v3470_v16 = vcombine.low %v3462_v62, %v3469_v49  ;;  %v2064_v21 = vrot.slane %v5211_v53, %v4984_v40  ;;  %v2068_v50 = vrot.slane %v5211_v53, %v4987_v41  ;;  %v3520_v26 = vcombine.low %v2040_v2, %v2044_v3 }
 0x2eb   :  { %v2867_v31 = vcombine.low %v2858_v4, %v2865_v13  ;;  %v2874_v1 = vrot.slane %v2866_v47, %v4990_v45  ;;  %v3521_v29 = vcombine.low %v2048_v5, %v2052_v8  ;;  %v3522_v32 = vcombine.low %v2056_v63, %v2060_v14 }
 0x2ec   :  { %3841 = vperm.xlu1 %4417, %v3470_v16   ;;  %v3523_v59 = vcombine.low %v2064_v21, %v2068_v50  ;;  %v3530_v35 = vrot.slane %v3520_v26, %v4990_v45  ;;  %v1560_v39 = vrot.slane %v5129_v30, %v4965_v0  ;;  %v1564_v9 = vrot.slane %v5129_v30, %v4969_v33 }
 0x2ed   :  { %v2881_v17 = vrot.slane %v2867_v31, %v4990_v45  ;;  %v3537_v53 = vrot.slane %v3521_v29, %v4990_v45  ;;  %v3544_v11 = vrot.slane %v3522_v32, %v4990_v45  ;;  %v1568_v7 = vrot.slane %v5129_v30, %v4972_v34 }
 0x2ee   :  { %v3551_v46 = vrot.slane %v3523_v59, %v4990_v45  ;;  %v1572_v48 = vrot.slane %v5129_v30, %v4975_v36  ;;  %v1576_v54 = vrot.slane %v5129_v30, %v4978_v37  ;;  %v1580_v20 = vrot.slane %v5129_v30, %v4981_v38 }
 0x2ef   :  { %v2882_v55 = vcombine.low %v2874_v1, %v2881_v17  ;;  %v3552_v57 = vcombine.low %v3530_v35, %v3537_v53  ;;  %v1584_v60 = vrot.slane %v5129_v30, %v4984_v40  ;;  %v1588_v10 = vrot.slane %v5129_v30, %v4987_v41 }
 0x2f0   :  { %v3553_v44 = vcombine.low %v3544_v11, %v3551_v46  ;;  %v2785_v62 = vcombine.low %v1560_v39, %v1564_v9  ;;  %v2786_v25 = vcombine.low %v1568_v7, %v1572_v48  ;;  %v2787_v2 = vcombine.low %v1576_v54, %v1580_v20 }
 0x2f1   :  { %3805 = vperm.xlu0 %4416, %v2882_v55   ;;  %v3560_v24 = vrot.slane %v3552_v57, %v4990_v45  ;;  %v2788_v58 = vcombine.low %v1584_v60, %v1588_v10  ;;  %v2008_v56 = vrot.slane %v5241_v6, %v4965_v0  ;;  %v2012_v3 = vrot.slane %v5241_v6, %v4969_v33 }
 0x2f2   :  { %v3567_v49 = vrot.slane %v3553_v44, %v4990_v45  ;;  %v2795_v4 = vrot.slane %v2785_v62, %v4990_v45  ;;  %v2802_v30 = vrot.slane %v2786_v25, %v4990_v45  ;;  %v2809_v5 = vrot.slane %v2787_v2, %v4990_v45 }
 0x2f3   :  { %v2816_v8 = vrot.slane %v2788_v58, %v4990_v45  ;;  %v2016_v13 = vrot.slane %v5241_v6, %v4972_v34  ;;  %v2020_v47 = vrot.slane %v5241_v6, %v4975_v36  ;;  %v2024_v63 = vrot.slane %v5241_v6, %v4978_v37 }
 0x2f4   :  { %v3568_v14 = vcombine.low %v3560_v24, %v3567_v49  ;;  %v2817_v16 = vcombine.low %v2795_v4, %v2802_v30  ;;  %v2028_v21 = vrot.slane %v5241_v6, %v4981_v38  ;;  %v2032_v50 = vrot.slane %v5241_v6, %v4984_v40 }
 0x2f5   :  { %v2818_v26 = vcombine.low %v2809_v5, %v2816_v8  ;;  %v2036_v31 = vrot.slane %v5241_v6, %v4987_v41  ;;  %v3471_v1 = vcombine.low %v2008_v56, %v2012_v3  ;;  %v3472_v29 = vcombine.low %v2016_v13, %v2020_v47 }
 0x2f6   :  { %3847 = vperm.xlu1 %4417, %v3568_v14   ;;  %v2825_v32 = vrot.slane %v2817_v16, %v4990_v45  ;;  %v3473_v59 = vcombine.low %v2024_v63, %v2028_v21  ;;  %v1688_v35 = vrot.slane %v5163_v23, %v4965_v0  ;;  %v1692_v39 = vrot.slane %v5163_v23, %v4969_v33 }
 0x2f7   :  { %v2832_v9 = vrot.slane %v2818_v26, %v4990_v45  ;;  %v3474_v17 = vcombine.low %v2032_v50, %v2036_v31  ;;  %v3481_v53 = vrot.slane %v3471_v1, %v4990_v45  ;;  %v3488_v11 = vrot.slane %v3472_v29, %v4990_v45 }
 0x2f8   :  { %v3495_v6 = vrot.slane %v3473_v59, %v4990_v45  ;;  %v1696_v7 = vrot.slane %v5163_v23, %v4972_v34  ;;  %v1700_v46 = vrot.slane %v5163_v23, %v4975_v36  ;;  %v1704_v48 = vrot.slane %v5163_v23, %v4978_v37 }
 0x2f9   :  { %v2833_v54 = vcombine.low %v2825_v32, %v2832_v9  ;;  %v3502_v20 = vrot.slane %v3474_v17, %v4990_v45  ;;  %v3503_v55 = vcombine.low %v3481_v53, %v3488_v11  ;;  %v1708_v57 = vrot.slane %v5163_v23, %v4981_v38 }
 0x2fa   :  { %v1712_v60 = vrot.slane %v5163_v23, %v4984_v40  ;;  %v1716_v10 = vrot.slane %v5163_v23, %v4987_v41  ;;  %v2981_v44 = vcombine.low %v1688_v35, %v1692_v39  ;;  %v2982_v62 = vcombine.low %v1696_v7, %v1700_v46 }
 0x2fb   :  { %3802 = vperm.xlu0 %4416, %v2833_v54   ;;  %v3504_v25 = vcombine.low %v3495_v6, %v3502_v20  ;;  %v3511_v2 = vrot.slane %v3503_v55, %v4990_v45  ;;  %v2983_v24 = vcombine.low %v1704_v48, %v1708_v57  ;;  %v2104_v58 = vrot.slane %v5271_v28, %v4965_v0 }
 0x2fc   :  { %v2984_v56 = vcombine.low %v1712_v60, %v1716_v10  ;;  %v2991_v3 = vrot.slane %v2981_v44, %v4990_v45  ;;  %v2998_v49 = vrot.slane %v2982_v62, %v4990_v45  ;;  %v2108_v4 = vrot.slane %v5271_v28, %v4969_v33 }
 0x2fd   :  { %v3518_v23 = vrot.slane %v3504_v25, %v4990_v45  ;;  %v3005_v30 = vrot.slane %v2983_v24, %v4990_v45  ;;  %v2112_v5 = vrot.slane %v5271_v28, %v4972_v34  ;;  %v2116_v8 = vrot.slane %v5271_v28, %v4975_v36 }
 0x2fe   :  { %v3012_v13 = vrot.slane %v2984_v56, %v4990_v45  ;;  %v3013_v47 = vcombine.low %v2991_v3, %v2998_v49  ;;  %v2120_v63 = vrot.slane %v5271_v28, %v4978_v37  ;;  %v2124_v14 = vrot.slane %v5271_v28, %v4981_v38 }
 0x2ff   :  { %v3519_v16 = vcombine.low %v3511_v2, %v3518_v23  ;;  %v2128_v21 = vrot.slane %v5271_v28, %v4984_v40  ;;  %v2132_v50 = vrot.slane %v5271_v28, %v4987_v41  ;;  %v3618_v26 = vcombine.low %v2104_v58, %v2108_v4 }
 0x300   :  { %v3014_v31 = vcombine.low %v3005_v30, %v3012_v13  ;;  %v3021_v1 = vrot.slane %v3013_v47, %v4990_v45  ;;  %v3619_v29 = vcombine.low %v2112_v5, %v2116_v8  ;;  %v3620_v32 = vcombine.low %v2120_v63, %v2124_v14 }
 0x301   :  { %3844 = vperm.xlu1 %4417, %v3519_v16   ;;  %v3621_v59 = vcombine.low %v2128_v21, %v2132_v50  ;;  %v3628_v35 = vrot.slane %v3618_v26, %v4990_v45  ;;  %v1752_v39 = vrot.slane %v5217_v12, %v4965_v0  ;;  %v1756_v9 = vrot.slane %v5217_v12, %v4969_v33 }
 0x302   :  { %v3028_v17 = vrot.slane %v3014_v31, %v4990_v45  ;;  %v3635_v28 = vrot.slane %v3619_v29, %v4990_v45  ;;  %v3642_v53 = vrot.slane %v3620_v32, %v4990_v45  ;;  %v1760_v11 = vrot.slane %v5217_v12, %v4972_v34 }
 0x303   :  { %v3649_v6 = vrot.slane %v3621_v59, %v4990_v45  ;;  %v1764_v7 = vrot.slane %v5217_v12, %v4975_v36  ;;  %v1768_v46 = vrot.slane %v5217_v12, %v4978_v37  ;;  %v1772_v48 = vrot.slane %v5217_v12, %v4981_v38 }
 0x304   :  { %v3029_v54 = vcombine.low %v3021_v1, %v3028_v17  ;;  %v3650_v20 = vcombine.low %v3628_v35, %v3635_v28  ;;  %v1776_v55 = vrot.slane %v5217_v12, %v4984_v40  ;;  %v1780_v57 = vrot.slane %v5217_v12, %v4987_v41 }
 0x305   :  { %v3651_v60 = vcombine.low %v3642_v53, %v3649_v6  ;;  %v3079_v10 = vcombine.low %v1752_v39, %v1756_v9  ;;  %v3080_v44 = vcombine.low %v1760_v11, %v1764_v7  ;;  %v3081_v62 = vcombine.low %v1768_v46, %v1772_v48 }
 0x306   :  { %3814 = vperm.xlu0 %4416, %v3029_v54   ;;  %v3658_v25 = vrot.slane %v3650_v20, %v4990_v45  ;;  %v3082_v2 = vcombine.low %v1776_v55, %v1780_v57  ;;  %v2072_v24 = vrot.slane %v5302_v18, %v4965_v0  ;;  %v2076_v58 = vrot.slane %v5302_v18, %v4969_v33 }
 0x307   :  { %v3665_v56 = vrot.slane %v3651_v60, %v4990_v45  ;;  %v3089_v3 = vrot.slane %v3079_v10, %v4990_v45  ;;  %v3096_v12 = vrot.slane %v3080_v44, %v4990_v45  ;;  %v3103_v49 = vrot.slane %v3081_v62, %v4990_v45 }
 0x308   :  { %v3110_v4 = vrot.slane %v3082_v2, %v4990_v45  ;;  %v2080_v23 = vrot.slane %v5302_v18, %v4972_v34  ;;  %v2084_v30 = vrot.slane %v5302_v18, %v4975_v36  ;;  %v2088_v5 = vrot.slane %v5302_v18, %v4978_v37 }
 0x309   :  { %v3666_v8 = vcombine.low %v3658_v25, %v3665_v56  ;;  %v3111_v13 = vcombine.low %v3089_v3, %v3096_v12  ;;  %v2092_v47 = vrot.slane %v5302_v18, %v4981_v38  ;;  %v2096_v63 = vrot.slane %v5302_v18, %v4984_v40 }
 0x30a   :  { %v3112_v14 = vcombine.low %v3103_v49, %v3110_v4  ;;  %v2100_v16 = vrot.slane %v5302_v18, %v4987_v41  ;;  %v3569_v21 = vcombine.low %v2072_v24, %v2076_v58  ;;  %v3570_v50 = vcombine.low %v2080_v23, %v2084_v30 }
 0x30b   :  { %3853 = vperm.xlu1 %4417, %v3666_v8   ;;  %v3119_v26 = vrot.slane %v3111_v13, %v4990_v45  ;;  %v3571_v31 = vcombine.low %v2088_v5, %v2092_v47  ;;  %v1816_v1 = vrot.slane %v5247_v52, %v4965_v0  ;;  %v1820_v29 = vrot.slane %v5247_v52, %v4969_v33 }
 0x30c   :  { %v3126_v32 = vrot.slane %v3112_v14, %v4990_v45  ;;  %v3572_v59 = vcombine.low %v2096_v63, %v2100_v16  ;;  %v3579_v35 = vrot.slane %v3569_v21, %v4990_v45  ;;  %v3586_v39 = vrot.slane %v3570_v50, %v4990_v45 }
 0x30d   :  { %v3593_v18 = vrot.slane %v3571_v31, %v4990_v45  ;;  %v1824_v9 = vrot.slane %v5247_v52, %v4972_v34  ;;  %v1828_v17 = vrot.slane %v5247_v52, %v4975_v36  ;;  %v1832_v28 = vrot.slane %v5247_v52, %v4978_v37 }
 0x30e   :  { %v3127_v53 = vcombine.low %v3119_v26, %v3126_v32  ;;  %v3600_v11 = vrot.slane %v3572_v59, %v4990_v45  ;;  %v3601_v6 = vcombine.low %v3579_v35, %v3586_v39  ;;  %v1836_v7 = vrot.slane %v5247_v52, %v4981_v38 }
 0x30f   :  { %v1840_v46 = vrot.slane %v5247_v52, %v4984_v40  ;;  %v1844_v48 = vrot.slane %v5247_v52, %v4987_v41  ;;  %v3177_v54 = vcombine.low %v1816_v1, %v1820_v29  ;;  %v3178_v20 = vcombine.low %v1824_v9, %v1828_v17 }
 0x310   :  { %3820 = vperm.xlu0 %4416, %v3127_v53   ;;  %v3602_v55 = vcombine.low %v3593_v18, %v3600_v11  ;;  %v3609_v57 = vrot.slane %v3601_v6, %v4990_v45  ;;  %v3179_v60 = vcombine.low %v1832_v28, %v1836_v7  ;;  %v2136_v10 = vrot.slane %v5343_v19, %v4965_v0 }
 0x311   :  { %v3180_v44 = vcombine.low %v1840_v46, %v1844_v48  ;;  %v3187_v62 = vrot.slane %v3177_v54, %v4990_v45  ;;  %v3194_v25 = vrot.slane %v3178_v20, %v4990_v45  ;;  %v2140_v2 = vrot.slane %v5343_v19, %v4969_v33 }
 0x312   :  { %v3616_v52 = vrot.slane %v3602_v55, %v4990_v45  ;;  %v3201_v24 = vrot.slane %v3179_v60, %v4990_v45  ;;  %v2144_v58 = vrot.slane %v5343_v19, %v4972_v34  ;;  %v2148_v56 = vrot.slane %v5343_v19, %v4975_v36 }
 0x313   :  { %v3208_v3 = vrot.slane %v3180_v44, %v4990_v45  ;;  %v3209_v12 = vcombine.low %v3187_v62, %v3194_v25  ;;  %v2152_v49 = vrot.slane %v5343_v19, %v4978_v37  ;;  %v2156_v4 = vrot.slane %v5343_v19, %v4981_v38 }
 0x314   :  { %v3617_v23 = vcombine.low %v3609_v57, %v3616_v52  ;;  %v2160_v30 = vrot.slane %v5343_v19, %v4984_v40  ;;  %v2164_v5 = vrot.slane %v5343_v19, %v4987_v41  ;;  %v3667_v8 = vcombine.low %v2136_v10, %v2140_v2 }
 0x315   :  { %v3210_v13 = vcombine.low %v3201_v24, %v3208_v3  ;;  %v3217_v47 = vrot.slane %v3209_v12, %v4990_v45  ;;  %v3668_v63 = vcombine.low %v2144_v58, %v2148_v56  ;;  %v3669_v14 = vcombine.low %v2152_v49, %v2156_v4 }
 0x316   :  { %3850 = vperm.xlu1 %4417, %v3617_v23   ;;  %v3670_v16 = vcombine.low %v2160_v30, %v2164_v5  ;;  %v3677_v21 = vrot.slane %v3667_v8, %v4990_v45  ;;  %v1880_v50 = vrot.slane %v5143_v51, %v4965_v0  ;;  %v1884_v26 = vrot.slane %v5143_v51, %v4969_v33 }
 0x317   :  { %v3224_v31 = vrot.slane %v3210_v13, %v4990_v45  ;;  %v3684_v19 = vrot.slane %v3668_v63, %v4990_v45  ;;  %v3691_v1 = vrot.slane %v3669_v14, %v4990_v45  ;;  %v1888_v29 = vrot.slane %v5143_v51, %v4972_v34 }
 0x318   :  { %v3698_v32 = vrot.slane %v3670_v16, %v4990_v45  ;;  %v1892_v59 = vrot.slane %v5143_v51, %v4975_v36  ;;  %v1896_v35 = vrot.slane %v5143_v51, %v4978_v37  ;;  %v1900_v39 = vrot.slane %v5143_v51, %v4981_v38 }
 0x319   :  { %v3225_v18 = vcombine.low %v3217_v47, %v3224_v31  ;;  %v3699_v9 = vcombine.low %v3677_v21, %v3684_v19  ;;  %v1904_v17 = vrot.slane %v5143_v51, %v4984_v40  ;;  %v1908_v28 = vrot.slane %v5143_v51, %v4987_v41 }
 0x31a   :  { %v3700_v53 = vcombine.low %v3691_v1, %v3698_v32  ;;  %v3275_v11 = vcombine.low %v1880_v50, %v1884_v26  ;;  %v3276_v6 = vcombine.low %v1888_v29, %v1892_v59  ;;  %v3277_v7 = vcombine.low %v1896_v35, %v1900_v39 }
 0x31b   :  { %3826 = vperm.xlu0 %4416, %v3225_v18   ;;  %v3707_v46 = vrot.slane %v3699_v9, %v4990_v45  ;;  %v3278_v48 = vcombine.low %v1904_v17, %v1908_v28  ;;  %v2168_v54 = vrot.slane %v5398_v43, %v4965_v0  ;;  %v2172_v20 = vrot.slane %v5398_v43, %v4969_v33 }
 0x31c   :  { %v3714_v55 = vrot.slane %v3700_v53, %v4990_v45  ;;  %v3285_v57 = vrot.slane %v3275_v11, %v4990_v45  ;;  %v3292_v51 = vrot.slane %v3276_v6, %v4990_v45  ;;  %v3299_v60 = vrot.slane %v3277_v7, %v4990_v45 }
 0x31d   :  { %v3306_v10 = vrot.slane %v3278_v48, %v4990_v45  ;;  %v2176_v44 = vrot.slane %v5398_v43, %v4972_v34  ;;  %v2180_v62 = vrot.slane %v5398_v43, %v4975_v36  ;;  %v2184_v25 = vrot.slane %v5398_v43, %v4978_v37 }
 0x31e   :  { %v3715_v2 = vcombine.low %v3707_v46, %v3714_v55  ;;  %v3307_v52 = vcombine.low %v3285_v57, %v3292_v51  ;;  %v2188_v24 = vrot.slane %v5398_v43, %v4981_v38  ;;  %v2192_v58 = vrot.slane %v5398_v43, %v4984_v40 }
 0x31f   :  { %v3308_v56 = vcombine.low %v3299_v60, %v3306_v10  ;;  %v2196_v3 = vrot.slane %v5398_v43, %v4987_v41  ;;  %v3716_v12 = vcombine.low %v2168_v54, %v2172_v20  ;;  %v3717_v49 = vcombine.low %v2176_v44, %v2180_v62 }
 0x320   :  { %3856 = vperm.xlu1 %4417, %v3715_v2   ;;  %v3315_v4 = vrot.slane %v3307_v52, %v4990_v45  ;;  %v3718_v23 = vcombine.low %v2184_v25, %v2188_v24  ;;  %v1944_v30 = vrot.slane %v5183_v61, %v4965_v0  ;;  %v1948_v5 = vrot.slane %v5183_v61, %v4969_v33 }
 0x321   :  { %v3322_v8 = vrot.slane %v3308_v56, %v4990_v45  ;;  %v3719_v13 = vcombine.low %v2192_v58, %v2196_v3  ;;  %v3726_v47 = vrot.slane %v3716_v12, %v4990_v45  ;;  %v3733_v63 = vrot.slane %v3717_v49, %v4990_v45 }
 0x322   :  { %v3740_v43 = vrot.slane %v3718_v23, %v4990_v45  ;;  %v1952_v14 = vrot.slane %v5183_v61, %v4972_v34  ;;  %v1956_v16 = vrot.slane %v5183_v61, %v4975_v36  ;;  %v1960_v21 = vrot.slane %v5183_v61, %v4978_v37 }
 0x323   :  { %v3323_v50 = vcombine.low %v3315_v4, %v3322_v8  ;;  %v3747_v26 = vrot.slane %v3719_v13, %v4990_v45  ;;  %v3748_v31 = vcombine.low %v3726_v47, %v3733_v63  ;;  %v1964_v19 = vrot.slane %v5183_v61, %v4981_v38 }
 0x324   :  { %v1968_v1 = vrot.slane %v5183_v61, %v4984_v40  ;;  %v1972_v29 = vrot.slane %v5183_v61, %v4987_v41  ;;  %v3373_v32 = vcombine.low %v1944_v30, %v1948_v5  ;;  %v3374_v59 = vcombine.low %v1952_v14, %v1956_v16 }
 0x325   :  { %3832 = vperm.xlu0 %4416, %v3323_v50   ;;  %v3749_v35 = vcombine.low %v3740_v43, %v3747_v26  ;;  %v3756_v39 = vrot.slane %v3748_v31, %v4990_v45  ;;  %v3375_v18 = vcombine.low %v1960_v21, %v1964_v19  ;;  %v1624_v9 = vrot.slane %v5316_v42, %v4965_v0 }
 0x326   :  { %v3376_v17 = vcombine.low %v1968_v1, %v1972_v29  ;;  %v3383_v28 = vrot.slane %v3373_v32, %v4990_v45  ;;  %v3390_v53 = vrot.slane %v3374_v59, %v4990_v45  ;;  %v1628_v11 = vrot.slane %v5316_v42, %v4969_v33  ;;  %v3767_v1 = vpop.permute.xlu1 %3766 }
 0x327   :  { %v3763_v61 = vrot.slane %v3749_v35, %v4990_v45  ;;  %v3397_v6 = vrot.slane %v3375_v18, %v4990_v45  ;;  %v1632_v7 = vrot.slane %v5316_v42, %v4972_v34  ;;  %v1636_v46 = vrot.slane %v5316_v42, %v4975_v36 }
 0x328   :  { %v3404_v48 = vrot.slane %v3376_v17, %v4990_v45  ;;  %v3405_v54 = vcombine.low %v3383_v28, %v3390_v53  ;;  %v1640_v20 = vrot.slane %v5316_v42, %v4978_v37  ;;  %v1644_v55 = vrot.slane %v5316_v42, %v4981_v38  ;;  %v3770_v28 = vpop.permute.xlu0 %3769 }
 0x329   :  { %v3764_v57 = vcombine.low %v3756_v39, %v3763_v61  ;;  %v1648_v51 = vrot.slane %v5316_v42, %v4984_v40  ;;  %v1652_v60 = vrot.slane %v5316_v42, %v4987_v41  ;;  %v2883_v10 = vcombine.low %v1624_v9, %v1628_v11 }
 0x32a   :  { %v3406_v44 = vcombine.low %v3397_v6, %v3404_v48  ;;  %v3413_v62 = vrot.slane %v3405_v54, %v4990_v45  ;;  %v2884_v25 = vcombine.low %v1632_v7, %v1636_v46  ;;  %v2885_v2 = vcombine.low %v1640_v20, %v1644_v55  ;;  %v3776_v29 = vpop.permute.xlu1 %3775 }
 0x32b   :  { %3859 = vperm.xlu1 %4417, %v3764_v57   ;;  %v2886_v52 = vcombine.low %v1648_v51, %v1652_v60  ;;  %v2893_v24 = vrot.slane %v2883_v10, %v4990_v45  ;;  %v1656_v58 = vrot.slane %v5350_v27, %v4965_v0  ;;  %v1660_v56 = vrot.slane %v5350_v27, %v4969_v33 }
 0x32c   :  { %v3420_v3 = vrot.slane %v3406_v44, %v4990_v45  ;;  %v2900_v42 = vrot.slane %v2884_v25, %v4990_v45  ;;  %v2907_v12 = vrot.slane %v2885_v2, %v4990_v45  ;;  %v1664_v49 = vrot.slane %v5350_v27, %v4972_v34 }
 0x32d   :  { %v2914_v4 = vrot.slane %v2886_v52, %v4990_v45  ;;  %v1668_v23 = vrot.slane %v5350_v27, %v4975_v36  ;;  %v1672_v0 = vrot.slane %v5350_v27, %v4978_v37  ;;  %v1676_v33 = vrot.slane %v5350_v27, %v4981_v38 }
 0x32e   :  { %v3421_v30 = vcombine.low %v3413_v62, %v3420_v3  ;;  %v2915_v5 = vcombine.low %v2893_v24, %v2900_v42  ;;  %v1680_v8 = vrot.slane %v5350_v27, %v4984_v40  ;;  %v1684_v13 = vrot.slane %v5350_v27, %v4987_v41  ;;  %v3773_v32 = vpop.permute.xlu1 %3772 }
 0x32f   :  { %v2916_v34 = vcombine.low %v2907_v12, %v2914_v4  ;;  %v2932_v47 = vcombine.low %v1656_v58, %v1660_v56  ;;  %v2933_v63 = vcombine.low %v1664_v49, %v1668_v23  ;;  %v2934_v43 = vcombine.low %v1672_v0, %v1676_v33 }
 0x330   :  { %3838 = vperm.xlu0 %4416, %v3421_v30   ;;  %v2923_v36 = vrot.slane %v2915_v5, %v4990_v45  ;;  %v2935_v14 = vcombine.low %v1680_v8, %v1684_v13  ;;  %v5791_v55 = vand.u32 127, %v1173_v15 }
 0x331   :  { %v2930_v37 = vrot.slane %v2916_v34, %v4990_v45  ;;  %v2942_v38 = vrot.slane %v2932_v47, %v4990_v45  ;;  %v2949_v16 = vrot.slane %v2933_v63, %v4990_v45  ;;  %v2956_v21 = vrot.slane %v2934_v43, %v4990_v45 }
 0x332   :  { %v2963_v40 = vrot.slane %v2935_v14, %v4990_v45  ;;  %v5764_v59 = vpop.permute.xlu1 %3781  ;;  %v3874_v51 = vadd.s32 4294967280, %v5791_v55  ;;  %v3867_v60 = vadd.s32 4294967288, %v5791_v55  ;;  %v3865_v44 = vsub.s32 %v5791_v55, %v4961_v22 }
 0x333   :  { %v2931_v50 = vcombine.low %v2923_v36, %v2930_v37  ;;  %v2964_v41 = vcombine.low %v2942_v38, %v2949_v16  ;;  %v3888_v25 = vadd.s32 4294967264, %v5791_v55  ;;  %v3881_v52 = vadd.s32 4294967272, %v5791_v55 }
 0x334   :  { %v2965_v27 = vcombine.low %v2956_v21, %v2963_v40  ;;  %v3877_v62 = vsub.s32 %v3874_v51, %v4961_v22  ;;  %v3870_v2 = vsub.s32 %v3867_v60, %v4961_v22  ;;  %v3866_v58 = vrot.slane %v3767_v1, %v3865_v44 }
 0x335   :  { %3808 = vperm.xlu0 %4416, %v2931_v50   ;;  %v2972_v26 = vrot.slane %v2964_v41, %v4990_v45  ;;  %v3895_v56 = vadd.s32 4294967256, %v5791_v55  ;;  %v3891_v12 = vsub.s32 %v3888_v25, %v4961_v22  ;;  %v3902_v49 = vadd.s32 4294967248, %v5791_v55 }
 0x336   :  { %v2979_v31 = vrot.slane %v2965_v27, %v4990_v45  ;;  %v3779_v35 = vpop.permute.xlu1 %3778  ;;  %v3878_v42 = vrot.slane %v3773_v32, %v3877_v62  ;;  %v3871_v4 = vrot.slane %v3770_v28, %v3870_v2  ;;  %v3884_v23 = vsub.s32 %v3881_v52, %v4961_v22 }
 0x337   :  { %v3898_v33 = vsub.s32 %v3895_v56, %v4961_v22  ;;  %v3892_v13 = vrot.slane %v3779_v35, %v3891_v12  ;;  %v3905_v34 = vsub.s32 %v3902_v49, %v4961_v22  ;;  %v3916_v43 = vadd.s32 4294967232, %v5791_v55 }
 0x338   :  { %v2980_v19 = vcombine.low %v2972_v26, %v2979_v31  ;;  %v3873_v0 = vsel %vm3872_vm2, %v3871_v4, %v3866_v58  ;;  %v3885_v63 = vrot.slane %v3776_v29, %v3884_v23  ;;  %v3909_v37 = vadd.s32 4294967240, %v5791_v55 }
 0x339   :  { %v3880_v8 = vsel %vm3879_vm3, %v3878_v42, %v3873_v0  ;;  %v3899_v38 = vrot.slane %v5764_v59, %v3898_v33  ;;  %v3923_v21 = vadd.s32 4294967224, %v5791_v55  ;;  %v3919_v31 = vsub.s32 %v3916_v43, %v4961_v22 }
 0x33a   :  { %3811 = vperm.xlu0 %4416, %v2980_v19   ;;  %v5766_v39 = vpop.permute.xlu1 %3787  ;;  %v3887_v16 = vsel %vm3886_vm4, %v3885_v63, %v3880_v8  ;;  %v3930_v19 = vadd.s32 4294967216, %v5791_v55  ;;  %v3912_v32 = vsub.s32 %v3909_v37, %v4961_v22  ;;  %v3937_v35 = vadd.s32 4294967208, %v5791_v55 }
 0x33b   :  { %v3894_v50 = vsel %vm3893_vm5, %v3892_v13, %v3887_v16  ;;  %v3944_v25 = vadd.s32 4294967200, %v5791_v55 }
 0x33c   :  { %v3901_v59 = vsel %vm3900_vm6, %v3899_v38, %v3894_v50  ;;  %v3940_v52 = vsub.s32 %v3937_v35, %v4961_v22 }
 0x33d   :  { %v3947_v4 = vsub.s32 %v3944_v25, %v4961_v22 }
 0x33e   :  { %v5768_v18 = vpop.permute.xlu1 %3784 }
 0x33f   :  { %v3906_v41 = vrot.slane %v5768_v18, %v3905_v34 }
 0x342   :  { %v5770_v9 = vpop.permute.xlu1 %3793 }
 0x346   :  { %v5772_v17 = vpop.permute.xlu1 %3790 }
 0x349   :  { %v5774_v11 = vpop.permute.xlu0 %3799 }
 0x350   :  { %v5778_v6 = vpop.permute.xlu0 %3796 }
 0x355   :  { %v3818_v53 = vpop.permute.xlu1 %3817 }
 0x356   :  { %v3979_v36 = vrot.slane %v3818_v53, %v3870_v2  ;;  %v3908_v53 = vsel %vm3907_vm7, %v3906_v41, %v3901_v59  ;;  %v3913_v2 = vrot.slane %v5766_v39, %v3912_v32 }
 0x35b   :  { %v5776_v61 = vpop.permute.xlu1 %3823 }
 0x35c   :  { %v3989_v1 = vrot.slane %v5776_v61, %v3884_v23  ;;  %v3920_v61 = vrot.slane %v5772_v17, %v3919_v31  ;;  %v3915_v17 = vsel %vm3914_vm8, %v3913_v2, %v3908_v53 }
 0x360   :  { %v5780_v7 = vpop.permute.xlu1 %3829 }
 0x365   :  { %v5784_v48 = vpop.permute.xlu1 %3835 }
 0x366   :  { %v4009_v49 = vrot.slane %v5784_v48, %v3912_v32 }
 0x36b   :  { %v5788_v20 = vpop.permute.xlu1 %3841 }
 0x370   :  { %v5782_v46 = vpop.permute.xlu0 %3805 }
 0x375   :  { %v5795_v10 = vpop.permute.xlu1 %3847 }
 0x37a   :  { %v5786_v54 = vpop.permute.xlu0 %3802 }
 0x37b   :  { %v3948_v63 = vrot.slane %v5786_v54, %v3947_v4 }
 0x380   :  { %v5804_v3 = vpop.permute.xlu1 %3844 }
 0x385   :  { %v3815_v57 = vpop.permute.xlu0 %3814 }
 0x386   :  { %v3975_v30 = vrot.slane %v3815_v57, %v3865_v44  ;;  %v3926_v57 = vsub.s32 %v3923_v21, %v4961_v22  ;;  %v3933_v44 = vsub.s32 %v3930_v19, %v4961_v22 }
 0x388   :  { %v3980_v40 = vsel %vm3872_vm2, %v3979_v36, %v3975_v30  ;;  %v3927_v56 = vrot.slane %v5770_v9, %v3926_v57  ;;  %v3934_v39 = vrot.slane %v5778_v6, %v3933_v44  ;;  %v3965_v9 = vadd.s32 4294967176, %v5791_v55 }
 0x389   :  { %v4024_v48 = vrot.slane %v5804_v3, %v3933_v44 }
 0x38a   :  { %v5814_v14 = vpop.permute.xlu1 %3853  ;;  %v3968_v38 = vsub.s32 %v3965_v9, %v4961_v22 }
 0x38f   :  { %v3821_v24 = vpop.permute.xlu0 %3820 }
 0x390   :  { %v3984_v47 = vrot.slane %v3821_v24, %v3877_v62  ;;  %v3999_v62 = vrot.slane %v5780_v7, %v3898_v33  ;;  %v3951_v24 = vadd.s32 4294967192, %v5791_v55  ;;  %v3958_v7 = vadd.s32 4294967184, %v5791_v55 }
 0x391   :  { %v4029_v55 = vrot.slane %v5795_v10, %v3940_v52 }
 0x392   :  { %v3985_v27 = vsel %vm3879_vm3, %v3984_v47, %v3980_v40  ;;  %v3954_v30 = vsub.s32 %v3951_v24, %v4961_v22  ;;  %v3961_v13 = vsub.s32 %v3958_v7, %v4961_v22 }
 0x393   :  { %v3990_v18 = vsel %vm3886_vm4, %v3989_v1, %v3985_v27 }
 0x394   :  { %v4039_v16 = vrot.slane %v5814_v14, %v3954_v30  ;;  %v3955_v22 = vrot.slane %v5782_v46, %v3954_v30 }
 0x395   :  { %v3851_v28 = vpop.permute.xlu1 %3850 }
 0x396   :  { %v4034_v36 = vrot.slane %v3851_v28, %v3947_v4 }
 0x39a   :  { %v3827_v5 = vpop.permute.xlu0 %3826 }
 0x39b   :  { %v3994_v26 = vrot.slane %v3827_v5, %v3891_v12  ;;  %v3922_v12 = vsel %vm3921_vm9, %v3920_v61, %v3915_v17  ;;  %v4019_v5 = vrot.slane %v5788_v20, %v3926_v57  ;;  %v3941_v20 = vrot.slane %v5774_v11, %v3940_v52 }
 0x39c   :  { %v3929_v6 = vsel %vm3928_vm10, %v3927_v56, %v3922_v12 }
 0x39d   :  { %v3995_v51 = vsel %vm3893_vm5, %v3994_v26, %v3990_v18  ;;  %v3936_v47 = vsel %vm3935_vm11, %v3934_v39, %v3929_v6 }
 0x39e   :  { %v4000_v58 = vsel %vm3900_vm6, %v3999_v62, %v3995_v51  ;;  %v3943_v54 = vsel %vm3942_vm12, %v3941_v20, %v3936_v47 }
 0x39f   :  { %v3857_v23 = vpop.permute.xlu1 %3856  ;;  %v3950_v11 = vsel %vm3949_vm13, %v3948_v63, %v3943_v54 }
 0x3a0   :  { %v4044_v50 = vrot.slane %v3857_v23, %v3961_v13  ;;  %v3957_v1 = vsel %vm3956_vm14, %v3955_v22, %v3950_v11 }
 0x3a4   :  { %v3833_v29 = vpop.permute.xlu0 %3832 }
 0x3a5   :  { %v4004_v60 = vrot.slane %v3833_v29, %v3905_v34 }
 0x3a7   :  { %v4005_v42 = vsel %vm3907_vm7, %v4004_v60, %v4000_v58 }
 0x3a8   :  { %v4010_v8 = vsel %vm3914_vm8, %v4009_v49, %v4005_v42 }
 0x3aa   :  { %v3860_v40 = vpop.permute.xlu1 %3859 }
 0x3af   :  { %v3839_v0 = vpop.permute.xlu0 %3838 }
 0x3b0   :  { %v4014_v33 = vrot.slane %v3839_v0, %v3919_v31  ;;  %v4049_v31 = vrot.slane %v3860_v40, %v3968_v38 }
 0x3b2   :  { %v4015_v34 = vsel %vm3921_vm9, %v4014_v33, %v4010_v8 }
 0x3b3   :  { %v4020_v43 = vsel %vm3928_vm10, %v4019_v5, %v4015_v34 }
 0x3b4   :  { %v4025_v37 = vsel %vm3935_vm11, %v4024_v48, %v4020_v43  ;;  %v3809_v3 = vpop.permute.xlu0 %3808 }
 0x3b5   :  { %v4030_v21 = vsel %vm3942_vm12, %v4029_v55, %v4025_v37  ;;  %v3962_v27 = vrot.slane %v3809_v3, %v3961_v13 }
 0x3b6   :  { %v4035_v10 = vsel %vm3949_vm13, %v4034_v36, %v4030_v21 }
 0x3b7   :  { %v4040_v41 = vsel %vm3956_vm14, %v4039_v16, %v4035_v10  ;;  %v3964_v32 = vsel %vm3963_vm15, %v3962_v27, %v3957_v1 }
 0x3b8   :  { %v4045_v26 = vsel %vm3963_vm15, %v4044_v50, %v4040_v41 }
 0x3b9   :  { %v3812_v14 = vpop.permute.xlu0 %3811  ;;  %v4050_v19 = vsel %vm3970_vm0, %v4049_v31, %v4045_v26 }
 0x3ba   :  { %v3969_v29 = vrot.slane %v3812_v14, %v3968_v38 }
 0x3bc   :  { %v3971_v59 = vsel %vm3970_vm0, %v3969_v29, %v3964_v32 }
 0x3bd   :  { %v4051_v35 = vcombine.low %v3971_v59, %v4050_v19 }
 0x3bf   :  { %v4058_v18 = vrot.slane %v4051_v35, %v4990_v45 }
 0x3c1   :  { %v4065_v28 = vrot.slane %v4058_v18, %v4990_v45 }
 0x3c3   :  { %4071 = vst.msk [vmem:[#allocation3] sm:$0x3] %vm4069_vm1, %v4065_v28 }
 0x3c4   :  { %4557 = shalt.err (!%p4554_p4)
}
 0x3c5   :  { %s4558_s2 = scalar_lea.hbm %s5891_s5, 32 }
 0x3c6   :  { %p4559_p5 = scmp.ne.s32.totalorder %s5891_s5, %s4558_s2  ;;  %p4562_p6 = scmp.lt.u32.totalorder %s4558_s2, %s5891_s5 }
 0x3c8   :  { %p4564_p7 = pnand %p4562_p6, %p4559_p5 }
 0x3ca   :  { %4567 = shalt.err (!%p4564_p7)
}
 0x3cb   :  { %4081 = dma.vmem_to_hbm [thread:$0]  %s4079_s30, 32, %s5891_s5, [#allocation4]  }
 0x3cc   :  { %4568 = dma.done.wait [#allocation4], 32  }
 0x3cd   :  { %4569 = vsyncadd [#allocation4], 4294967264 }
 0x3ce   :  { %4085 = vsyncpa [#allocation4], 1 }

</bundles_post_ra>
